<compile_context>
chip_gen: v7x
topology: tpu7x:2x2x1
jax: 0.10.0
libtpu: 0.0.40
codegen_flags: <defaults>
</compile_context>

<pallas_src>
import functools

import jax
import jax.numpy as jnp
from jax.experimental import pallas as pl
from jax.experimental.pallas import tpu as pltpu

_EPS = 1e-5


def _round_up(v, m):
    return (v + m - 1) // m * m


def block_kernel(x_ref, w1_ref, w2_ref, pv_ref, pos_ref, anc_ref, o_ref,
                 *, B, H, W, Cin, Cout, Cp):
    """Fused ResidualConcatBlock forward in channel-major (C, B*H*W) layout."""
    N = B * H * W                       # flattened spatial axis (on lanes)
    Np = o_ref.shape[1]                 # B * (H//2) * (W//2) pooled positions

    x = x_ref[...]                      # (Cp, N)   rows >= Cin are zero
    pv = pv_ref[...]                    # (Cp, 8)   packed per-channel params
    xcol = pos_ref[0:1, :]              # (1, N)    x coordinate of each lane
    yrow = pos_ref[1:2, :]              # (1, N)    y coordinate of each lane

    b1, g1, be1 = pv[:Cout, 0:1], pv[:Cout, 1:2], pv[:Cout, 2:3]
    b2, g2, be2 = pv[:Cout, 3:4], pv[:Cout, 4:5], pv[:Cout, 5:6]
    g0, be0 = pv[:Cin, 6:7], pv[:Cin, 7:8]

    inv_n = jnp.float32(1.0 / N)

    def bn(h, gamma, beta):
        # training-mode batch-norm, single pass (sum and sum of squares)
        s = jnp.sum(h, axis=1, keepdims=True)
        ss = jnp.sum(h * h, axis=1, keepdims=True)
        mean = s * inv_n
        var = ss * inv_n - mean * mean                    # biased variance
        return (h - mean) * jax.lax.rsqrt(var + jnp.float32(_EPS)) * gamma + beta

    def conv3x3(h, wmat):
        # h: (Cp, N), wmat: (Cout, 9*Cp).  Each tap is a lane-roll of the
        # whole flattened image; out-of-image positions are masked to zero,
        # which also kills any cross-row / cross-batch wraparound.
        taps = []
        for dy in (-1, 0, 1):
            for dx in (-1, 0, 1):
                if dy == 0 and dx == 0:
                    taps.append(h)
                    continue
                shift = (-(dy * W + dx)) % N
                t = pltpu.roll(h, shift=shift, axis=1)
                ok = ((xcol + dx >= 0) & (xcol + dx < W) &
                      (yrow + dy >= 0) & (yrow + dy < H))
                taps.append(jnp.where(ok, t, 0.0))
        im2col = jnp.concatenate(taps, axis=0)            # (9*Cp, N)
        return jnp.dot(wmat, im2col, preferred_element_type=jnp.float32)

    # ---------------- sub_layer1: conv -> BN -> ReLU ------------------------
    h1 = jnp.maximum(bn(conv3x3(x, w1_ref[...]) + b1, g1, be1), 0.0)
    if Cout != Cp:                      # keep Cp sublane rows for next im2col
        h1 = jnp.concatenate(
            [h1, jnp.zeros((Cp - Cout, N), jnp.float32)], axis=0)

    # ---------------- sub_layer2: conv -> BN --------------------------------
    h2 = bn(conv3x3(h1, w2_ref[...]) + b2, g2, be2)       # (Cout, N)

    # ---------------- align branch: BN on the raw input ---------------------
    res = bn(x[:Cin], g0, be0)                            # (Cin, N)

    # ---------------- channel concat (conv branch first) + ReLU -------------
    cat = jnp.maximum(jnp.concatenate([h2, res], axis=0), 0.0)   # (Ctot, N)

    # ---------------- fused 2x2 / stride-2 max-pool --------------------------
    # window max lands on every (even y, even x) "anchor" lane
    m = jnp.maximum(cat, pltpu.roll(cat, shift=N - 1, axis=1))   # pair (x, x+1)
    m = jnp.maximum(m, pltpu.roll(m, shift=N - W, axis=1))       # pair (y, y+1)
    # gather the Np anchors with an exact 0/1 selection matmul (lane-space
    # permutation done on the MXU, no strided slices / second dispatch)
    ncol = jax.lax.broadcasted_iota(jnp.int32, (N, Np), 0)
    sel = (ncol == anc_ref[...]).astype(jnp.float32)             # (N, Np)
    # hi/lo split keeps the gather f32-exact even if the MXU rounds operands
    m_hi = m.astype(jnp.bfloat16).astype(jnp.float32)
    m_lo = m - m_hi
    o_ref[...] = (jnp.dot(m_hi, sel, preferred_element_type=jnp.float32) +
                  jnp.dot(m_lo, sel, preferred_element_type=jnp.float32))


def _pack_conv_weight(w_hwio, cp):
    """(3,3,cin,cout) HWIO -> (cout, 9*cp), K index = tap*cp + cin (zero pad)."""
    kh, kw, cin, cout = w_hwio.shape
    w = jnp.transpose(w_hwio.reshape(kh * kw, cin, cout), (2, 0, 1))  # (co,9,ci)
    w = jnp.pad(w, ((0, 0), (0, 0), (0, cp - cin)))
    return w.reshape(cout, kh * kw * cp).astype(jnp.float32)


def _pack_channel_params(vectors, cp):
    """Pack per-channel vectors as zero-padded columns of one (cp, n) array."""
    cols = [jnp.pad(jnp.asarray(v, jnp.float32).reshape(-1),
                    (0, cp - v.shape[-1])) for v in vectors]
    return jnp.stack(cols, axis=1)


@jax.jit
def residual_concat_block(x_nchw, params):
    """Forward pass of ResidualConcatBlock.  Input / output are NCHW."""
    B, Cin, H, W = x_nchw.shape
    Cout = params["w1"].shape[-1]
    Ctot = Cin + Cout
    assert H % 2 == 0 and W % 2 == 0, "2x2/2 max-pool assumes even H and W"
    Cp = _round_up(max(Cin, Cout), 8)          # sublane-aligned channel count
    N = B * H * W
    Hp, Wp = H // 2, W // 2
    Np = B * Hp * Wp

    # glue: NCHW -> lane-dense channel-major (Cp, B*H*W) layout
    x_cn = jnp.transpose(x_nchw.astype(jnp.float32), (1, 0, 2, 3)).reshape(Cin, N)
    x_cn = jnp.pad(x_cn, ((0, Cp - Cin), (0, 0)))

    # glue: packed parameters (3 arrays instead of 11 tiny VMEM inputs)
    w1p = _pack_conv_weight(params["w1"], Cp)              # (Cout, 9*Cp)
    w2p = _pack_conv_weight(params["w2"], Cp)              # (Cout, 9*Cp)
    pv = _pack_channel_params(
        [params["b1"], params["g1"], params["be1"],
         params["b2"], params["g2"], params["be2"],
         params["g0"], params["be0"]], Cp)                 # (Cp, 8)

    # glue: index helpers (keeps integer div/mod out of the kernel)
    n_iota = jnp.arange(N, dtype=jnp.int32)
    pos = jnp.stack([n_iota % W, (n_iota // W) % H], axis=0)        # (2, N)
    m_iota = jnp.arange(Np, dtype=jnp.int32)
    bb, rr = m_iota // (Hp * Wp), m_iota % (Hp * Wp)
    anchor = (bb * (H * W) + (rr // Wp) * (2 * W) +
              (rr % Wp) * 2).reshape(1, Np).astype(jnp.int32)       # (1, Np)

    vmem = pl.BlockSpec(memory_space=pltpu.MemorySpace.VMEM)
    pooled = pl.pallas_call(
        functools.partial(block_kernel, B=B, H=H, W=W,
                          Cin=Cin, Cout=Cout, Cp=Cp),
        out_shape=jax.ShapeDtypeStruct((Ctot, Np), jnp.float32),
        in_specs=[vmem] * 6,
        out_specs=vmem,
    )(x_cn, w1p, w2p, pv, pos, anchor)

    # NOTE: batch-norm uses global batch statistics, so a gridded / megacore
    # (v7x) version would need a separate stats pass before normalization;
    # at these VMEM-resident sizes a single fused grid-less kernel is faster.
    return jnp.transpose(pooled.reshape(Ctot, B, Hp, Wp), (1, 0, 2, 3))


# ------------------------------ pure-JAX reference ---------------------------
def reference(x_nchw, params):
    x = jnp.transpose(x_nchw, (0, 2, 3, 1)).astype(jnp.float32)     # NHWC

    def conv(h, w, b):
        y = jax.lax.conv_general_dilated(
            h, w, window_strides=(1, 1), padding="SAME",
            dimension_numbers=("NHWC", "HWIO", "NHWC"))
        return y + b.reshape(1, 1, 1, -1)

    def bn(h, g, be):
        m = jnp.mean(h, axis=(0, 1, 2), keepdims=True)
        v = jnp.mean((h - m) ** 2, axis=(0, 1, 2), keepdims=True)
        return (h - m) / jnp.sqrt(v + _EPS) * g.reshape(1, 1, 1, -1) \
            + be.reshape(1, 1, 1, -1)

    h1 = jax.nn.relu(bn(conv(x, params["w1"], params["b1"]),
                        params["g1"], params["be1"]))
    h2 = bn(conv(h1, params["w2"], params["b2"]), params["g2"], params["be2"])
    res = bn(x, params["g0"], params["be0"])
    cat = jax.nn.relu(jnp.concatenate([h2, res], axis=-1))
    pooled = jax.lax.reduce_window(cat, -jnp.inf, jax.lax.max,
                                   (1, 2, 2, 1), (1, 2, 2, 1), "VALID")
    return jnp.transpose(pooled, (0, 3, 1, 2))


if __name__ == "__main__":
    B, Cin, Cout, H, W = 2, 4, 8, 16, 16
    key = jax.random.PRNGKey(0)
    keys = jax.random.split(key, 12)

    x = jax.random.normal(keys[0], (B, Cin, H, W), jnp.float32)
    params = dict(
        w1=0.2 * jax.random.normal(keys[1], (3, 3, Cin, Cout), jnp.float32),
        b1=0.1 * jax.random.normal(keys[2], (Cout,), jnp.float32),
        g1=1.0 + 0.1 * jax.random.normal(keys[3], (Cout,), jnp.float32),
        be1=0.1 * jax.random.normal(keys[4], (Cout,), jnp.float32),
        w2=0.2 * jax.random.normal(keys[5], (3, 3, Cout, Cout), jnp.float32),
        b2=0.1 * jax.random.normal(keys[6], (Cout,), jnp.float32),
        g2=1.0 + 0.1 * jax.random.normal(keys[7], (Cout,), jnp.float32),
        be2=0.1 * jax.random.normal(keys[8], (Cout,), jnp.float32),
        g0=1.0 + 0.1 * jax.random.normal(keys[9], (Cin,), jnp.float32),
        be0=0.1 * jax.random.normal(keys[10], (Cin,), jnp.float32),
    )

    out = jax.block_until_ready(residual_concat_block(x, params))
    ref = jax.block_until_ready(reference(x, params))

    assert out.shape == (B, Cin + Cout, H // 2, W // 2), out.shape
    max_err = float(jnp.max(jnp.abs(out - ref)))
    assert jnp.allclose(out, ref, atol=1e-4, rtol=1e-4), f"max_err={max_err}"
    print("KERNEL_OK")
</pallas_src>

<mosaic_0001>
module attributes {stable_mosaic.version = 11 : i64} {
  func.func @block_kernel(%arg0: memref<8x512xf32, #tpu.memory_space<vmem>>, %arg1: memref<8x72xf32, #tpu.memory_space<vmem>>, %arg2: memref<8x72xf32, #tpu.memory_space<vmem>>, %arg3: memref<8x8xf32, #tpu.memory_space<vmem>>, %arg4: memref<2x512xi32, #tpu.memory_space<vmem>>, %arg5: memref<1x128xi32, #tpu.memory_space<vmem>>, %arg6: memref<12x128xf32, #tpu.memory_space<vmem>>) attributes {dimension_semantics = [], scalar_prefetch = 0 : i64, scratch_operands = 0 : i64, tpu.core_type = #tpu.core_type<tc>} {
    %c0 = arith.constant 0 : index
    %c0_0 = arith.constant 0 : index
    %0 = vector.load %arg0[%c0, %c0_0] : memref<8x512xf32, #tpu.memory_space<vmem>>, vector<8x512xf32>
    %c0_1 = arith.constant 0 : index
    %c0_2 = arith.constant 0 : index
    %1 = vector.load %arg3[%c0_1, %c0_2] : memref<8x8xf32, #tpu.memory_space<vmem>>, vector<8x8xf32>
    %c0_3 = arith.constant 0 : index
    %c0_4 = arith.constant 0 : index
    %2 = vector.load %arg4[%c0_3, %c0_4] : memref<2x512xi32, #tpu.memory_space<vmem>>, vector<1x512xi32>
    %c1 = arith.constant 1 : index
    %c0_5 = arith.constant 0 : index
    %3 = vector.load %arg4[%c1, %c0_5] : memref<2x512xi32, #tpu.memory_space<vmem>>, vector<1x512xi32>
    %4 = vector.extract_strided_slice %1 {offsets = [0, 0], sizes = [8, 1], strides = [1, 1]} : vector<8x8xf32> to vector<8x1xf32>
    %5 = vector.extract_strided_slice %1 {offsets = [0, 1], sizes = [8, 1], strides = [1, 1]} : vector<8x8xf32> to vector<8x1xf32>
    %6 = vector.extract_strided_slice %1 {offsets = [0, 2], sizes = [8, 1], strides = [1, 1]} : vector<8x8xf32> to vector<8x1xf32>
    %7 = vector.extract_strided_slice %1 {offsets = [0, 3], sizes = [8, 1], strides = [1, 1]} : vector<8x8xf32> to vector<8x1xf32>
    %8 = vector.extract_strided_slice %1 {offsets = [0, 4], sizes = [8, 1], strides = [1, 1]} : vector<8x8xf32> to vector<8x1xf32>
    %9 = vector.extract_strided_slice %1 {offsets = [0, 5], sizes = [8, 1], strides = [1, 1]} : vector<8x8xf32> to vector<8x1xf32>
    %10 = vector.extract_strided_slice %1 {offsets = [0, 6], sizes = [4, 1], strides = [1, 1]} : vector<8x8xf32> to vector<4x1xf32>
    %11 = vector.extract_strided_slice %1 {offsets = [0, 7], sizes = [4, 1], strides = [1, 1]} : vector<8x8xf32> to vector<4x1xf32>
    %c0_6 = arith.constant 0 : index
    %c0_7 = arith.constant 0 : index
    %12 = vector.load %arg1[%c0_6, %c0_7] : memref<8x72xf32, #tpu.memory_space<vmem>>, vector<8x72xf32>
    %c17_i32 = arith.constant 17 : i32
    %13 = tpu.dynamic_rotate %0 by %c17_i32 dim 1 : vector<8x512xf32>, i32 -> vector<8x512xf32>
    %c-1_i32 = arith.constant -1 : i32
    %14 = vector.broadcast %c-1_i32 : i32 to vector<1x512xi32>
    %15 = arith.addi %2, %14 : vector<1x512xi32>
    %c0_i32 = arith.constant 0 : i32
    %16 = vector.broadcast %c0_i32 : i32 to vector<1x512xi32>
    %17 = arith.cmpi sge, %15, %16 : vector<1x512xi32>
    %c-1_i32_8 = arith.constant -1 : i32
    %18 = vector.broadcast %c-1_i32_8 : i32 to vector<1x512xi32>
    %19 = arith.addi %2, %18 : vector<1x512xi32>
    %c16_i32 = arith.constant 16 : i32
    %20 = vector.broadcast %c16_i32 : i32 to vector<1x512xi32>
    %21 = arith.cmpi slt, %19, %20 : vector<1x512xi32>
    %22 = arith.andi %17, %21 : vector<1x512xi1>
    %c-1_i32_9 = arith.constant -1 : i32
    %23 = vector.broadcast %c-1_i32_9 : i32 to vector<1x512xi32>
    %24 = arith.addi %3, %23 : vector<1x512xi32>
    %c0_i32_10 = arith.constant 0 : i32
    %25 = vector.broadcast %c0_i32_10 : i32 to vector<1x512xi32>
    %26 = arith.cmpi sge, %24, %25 : vector<1x512xi32>
    %27 = arith.andi %22, %26 : vector<1x512xi1>
    %c-1_i32_11 = arith.constant -1 : i32
    %28 = vector.broadcast %c-1_i32_11 : i32 to vector<1x512xi32>
    %29 = arith.addi %3, %28 : vector<1x512xi32>
    %c16_i32_12 = arith.constant 16 : i32
    %30 = vector.broadcast %c16_i32_12 : i32 to vector<1x512xi32>
    %31 = arith.cmpi slt, %29, %30 : vector<1x512xi32>
    %32 = arith.andi %27, %31 : vector<1x512xi1>
    %cst = arith.constant 0.000000e+00 : f32
    %33 = vector.shape_cast %32 : vector<1x512xi1> to vector<1x512xi1>
    %34 = vector.broadcast %33 : vector<1x512xi1> to vector<8x512xi1>
    %35 = vector.broadcast %cst : f32 to vector<8x512xf32>
    %36 = arith.select %34, %13, %35 : vector<8x512xi1>, vector<8x512xf32>
    %c16_i32_13 = arith.constant 16 : i32
    %37 = tpu.dynamic_rotate %0 by %c16_i32_13 dim 1 : vector<8x512xf32>, i32 -> vector<8x512xf32>
    %c0_i32_14 = arith.constant 0 : i32
    %38 = vector.broadcast %c0_i32_14 : i32 to vector<1x512xi32>
    %39 = arith.addi %2, %38 : vector<1x512xi32>
    %c0_i32_15 = arith.constant 0 : i32
    %40 = vector.broadcast %c0_i32_15 : i32 to vector<1x512xi32>
    %41 = arith.cmpi sge, %39, %40 : vector<1x512xi32>
    %c0_i32_16 = arith.constant 0 : i32
    %42 = vector.broadcast %c0_i32_16 : i32 to vector<1x512xi32>
    %43 = arith.addi %2, %42 : vector<1x512xi32>
    %c16_i32_17 = arith.constant 16 : i32
    %44 = vector.broadcast %c16_i32_17 : i32 to vector<1x512xi32>
    %45 = arith.cmpi slt, %43, %44 : vector<1x512xi32>
    %46 = arith.andi %41, %45 : vector<1x512xi1>
    %c-1_i32_18 = arith.constant -1 : i32
    %47 = vector.broadcast %c-1_i32_18 : i32 to vector<1x512xi32>
    %48 = arith.addi %3, %47 : vector<1x512xi32>
    %c0_i32_19 = arith.constant 0 : i32
    %49 = vector.broadcast %c0_i32_19 : i32 to vector<1x512xi32>
    %50 = arith.cmpi sge, %48, %49 : vector<1x512xi32>
    %51 = arith.andi %46, %50 : vector<1x512xi1>
    %c-1_i32_20 = arith.constant -1 : i32
    %52 = vector.broadcast %c-1_i32_20 : i32 to vector<1x512xi32>
    %53 = arith.addi %3, %52 : vector<1x512xi32>
    %c16_i32_21 = arith.constant 16 : i32
    %54 = vector.broadcast %c16_i32_21 : i32 to vector<1x512xi32>
    %55 = arith.cmpi slt, %53, %54 : vector<1x512xi32>
    %56 = arith.andi %51, %55 : vector<1x512xi1>
    %cst_22 = arith.constant 0.000000e+00 : f32
    %57 = vector.shape_cast %56 : vector<1x512xi1> to vector<1x512xi1>
    %58 = vector.broadcast %57 : vector<1x512xi1> to vector<8x512xi1>
    %59 = vector.broadcast %cst_22 : f32 to vector<8x512xf32>
    %60 = arith.select %58, %37, %59 : vector<8x512xi1>, vector<8x512xf32>
    %c15_i32 = arith.constant 15 : i32
    %61 = tpu.dynamic_rotate %0 by %c15_i32 dim 1 : vector<8x512xf32>, i32 -> vector<8x512xf32>
    %c1_i32 = arith.constant 1 : i32
    %62 = vector.broadcast %c1_i32 : i32 to vector<1x512xi32>
    %63 = arith.addi %2, %62 : vector<1x512xi32>
    %c0_i32_23 = arith.constant 0 : i32
    %64 = vector.broadcast %c0_i32_23 : i32 to vector<1x512xi32>
    %65 = arith.cmpi sge, %63, %64 : vector<1x512xi32>
    %c1_i32_24 = arith.constant 1 : i32
    %66 = vector.broadcast %c1_i32_24 : i32 to vector<1x512xi32>
    %67 = arith.addi %2, %66 : vector<1x512xi32>
    %c16_i32_25 = arith.constant 16 : i32
    %68 = vector.broadcast %c16_i32_25 : i32 to vector<1x512xi32>
    %69 = arith.cmpi slt, %67, %68 : vector<1x512xi32>
    %70 = arith.andi %65, %69 : vector<1x512xi1>
    %c-1_i32_26 = arith.constant -1 : i32
    %71 = vector.broadcast %c-1_i32_26 : i32 to vector<1x512xi32>
    %72 = arith.addi %3, %71 : vector<1x512xi32>
    %c0_i32_27 = arith.constant 0 : i32
    %73 = vector.broadcast %c0_i32_27 : i32 to vector<1x512xi32>
    %74 = arith.cmpi sge, %72, %73 : vector<1x512xi32>
    %75 = arith.andi %70, %74 : vector<1x512xi1>
    %c-1_i32_28 = arith.constant -1 : i32
    %76 = vector.broadcast %c-1_i32_28 : i32 to vector<1x512xi32>
    %77 = arith.addi %3, %76 : vector<1x512xi32>
    %c16_i32_29 = arith.constant 16 : i32
    %78 = vector.broadcast %c16_i32_29 : i32 to vector<1x512xi32>
    %79 = arith.cmpi slt, %77, %78 : vector<1x512xi32>
    %80 = arith.andi %75, %79 : vector<1x512xi1>
    %cst_30 = arith.constant 0.000000e+00 : f32
    %81 = vector.shape_cast %80 : vector<1x512xi1> to vector<1x512xi1>
    %82 = vector.broadcast %81 : vector<1x512xi1> to vector<8x512xi1>
    %83 = vector.broadcast %cst_30 : f32 to vector<8x512xf32>
    %84 = arith.select %82, %61, %83 : vector<8x512xi1>, vector<8x512xf32>
    %c1_i32_31 = arith.constant 1 : i32
    %85 = tpu.dynamic_rotate %0 by %c1_i32_31 dim 1 : vector<8x512xf32>, i32 -> vector<8x512xf32>
    %c-1_i32_32 = arith.constant -1 : i32
    %86 = vector.broadcast %c-1_i32_32 : i32 to vector<1x512xi32>
    %87 = arith.addi %2, %86 : vector<1x512xi32>
    %c0_i32_33 = arith.constant 0 : i32
    %88 = vector.broadcast %c0_i32_33 : i32 to vector<1x512xi32>
    %89 = arith.cmpi sge, %87, %88 : vector<1x512xi32>
    %c-1_i32_34 = arith.constant -1 : i32
    %90 = vector.broadcast %c-1_i32_34 : i32 to vector<1x512xi32>
    %91 = arith.addi %2, %90 : vector<1x512xi32>
    %c16_i32_35 = arith.constant 16 : i32
    %92 = vector.broadcast %c16_i32_35 : i32 to vector<1x512xi32>
    %93 = arith.cmpi slt, %91, %92 : vector<1x512xi32>
    %94 = arith.andi %89, %93 : vector<1x512xi1>
    %c0_i32_36 = arith.constant 0 : i32
    %95 = vector.broadcast %c0_i32_36 : i32 to vector<1x512xi32>
    %96 = arith.addi %3, %95 : vector<1x512xi32>
    %c0_i32_37 = arith.constant 0 : i32
    %97 = vector.broadcast %c0_i32_37 : i32 to vector<1x512xi32>
    %98 = arith.cmpi sge, %96, %97 : vector<1x512xi32>
    %99 = arith.andi %94, %98 : vector<1x512xi1>
    %c0_i32_38 = arith.constant 0 : i32
    %100 = vector.broadcast %c0_i32_38 : i32 to vector<1x512xi32>
    %101 = arith.addi %3, %100 : vector<1x512xi32>
    %c16_i32_39 = arith.constant 16 : i32
    %102 = vector.broadcast %c16_i32_39 : i32 to vector<1x512xi32>
    %103 = arith.cmpi slt, %101, %102 : vector<1x512xi32>
    %104 = arith.andi %99, %103 : vector<1x512xi1>
    %cst_40 = arith.constant 0.000000e+00 : f32
    %105 = vector.shape_cast %104 : vector<1x512xi1> to vector<1x512xi1>
    %106 = vector.broadcast %105 : vector<1x512xi1> to vector<8x512xi1>
    %107 = vector.broadcast %cst_40 : f32 to vector<8x512xf32>
    %108 = arith.select %106, %85, %107 : vector<8x512xi1>, vector<8x512xf32>
    %c511_i32 = arith.constant 511 : i32
    %109 = tpu.dynamic_rotate %0 by %c511_i32 dim 1 : vector<8x512xf32>, i32 -> vector<8x512xf32>
    %c1_i32_41 = arith.constant 1 : i32
    %110 = vector.broadcast %c1_i32_41 : i32 to vector<1x512xi32>
    %111 = arith.addi %2, %110 : vector<1x512xi32>
    %c0_i32_42 = arith.constant 0 : i32
    %112 = vector.broadcast %c0_i32_42 : i32 to vector<1x512xi32>
    %113 = arith.cmpi sge, %111, %112 : vector<1x512xi32>
    %c1_i32_43 = arith.constant 1 : i32
    %114 = vector.broadcast %c1_i32_43 : i32 to vector<1x512xi32>
    %115 = arith.addi %2, %114 : vector<1x512xi32>
    %c16_i32_44 = arith.constant 16 : i32
    %116 = vector.broadcast %c16_i32_44 : i32 to vector<1x512xi32>
    %117 = arith.cmpi slt, %115, %116 : vector<1x512xi32>
    %118 = arith.andi %113, %117 : vector<1x512xi1>
    %c0_i32_45 = arith.constant 0 : i32
    %119 = vector.broadcast %c0_i32_45 : i32 to vector<1x512xi32>
    %120 = arith.addi %3, %119 : vector<1x512xi32>
    %c0_i32_46 = arith.constant 0 : i32
    %121 = vector.broadcast %c0_i32_46 : i32 to vector<1x512xi32>
    %122 = arith.cmpi sge, %120, %121 : vector<1x512xi32>
    %123 = arith.andi %118, %122 : vector<1x512xi1>
    %c0_i32_47 = arith.constant 0 : i32
    %124 = vector.broadcast %c0_i32_47 : i32 to vector<1x512xi32>
    %125 = arith.addi %3, %124 : vector<1x512xi32>
    %c16_i32_48 = arith.constant 16 : i32
    %126 = vector.broadcast %c16_i32_48 : i32 to vector<1x512xi32>
    %127 = arith.cmpi slt, %125, %126 : vector<1x512xi32>
    %128 = arith.andi %123, %127 : vector<1x512xi1>
    %cst_49 = arith.constant 0.000000e+00 : f32
    %129 = vector.shape_cast %128 : vector<1x512xi1> to vector<1x512xi1>
    %130 = vector.broadcast %129 : vector<1x512xi1> to vector<8x512xi1>
    %131 = vector.broadcast %cst_49 : f32 to vector<8x512xf32>
    %132 = arith.select %130, %109, %131 : vector<8x512xi1>, vector<8x512xf32>
    %c497_i32 = arith.constant 497 : i32
    %133 = tpu.dynamic_rotate %0 by %c497_i32 dim 1 : vector<8x512xf32>, i32 -> vector<8x512xf32>
    %c-1_i32_50 = arith.constant -1 : i32
    %134 = vector.broadcast %c-1_i32_50 : i32 to vector<1x512xi32>
    %135 = arith.addi %2, %134 : vector<1x512xi32>
    %c0_i32_51 = arith.constant 0 : i32
    %136 = vector.broadcast %c0_i32_51 : i32 to vector<1x512xi32>
    %137 = arith.cmpi sge, %135, %136 : vector<1x512xi32>
    %c-1_i32_52 = arith.constant -1 : i32
    %138 = vector.broadcast %c-1_i32_52 : i32 to vector<1x512xi32>
    %139 = arith.addi %2, %138 : vector<1x512xi32>
    %c16_i32_53 = arith.constant 16 : i32
    %140 = vector.broadcast %c16_i32_53 : i32 to vector<1x512xi32>
    %141 = arith.cmpi slt, %139, %140 : vector<1x512xi32>
    %142 = arith.andi %137, %141 : vector<1x512xi1>
    %c1_i32_54 = arith.constant 1 : i32
    %143 = vector.broadcast %c1_i32_54 : i32 to vector<1x512xi32>
    %144 = arith.addi %3, %143 : vector<1x512xi32>
    %c0_i32_55 = arith.constant 0 : i32
    %145 = vector.broadcast %c0_i32_55 : i32 to vector<1x512xi32>
    %146 = arith.cmpi sge, %144, %145 : vector<1x512xi32>
    %147 = arith.andi %142, %146 : vector<1x512xi1>
    %c1_i32_56 = arith.constant 1 : i32
    %148 = vector.broadcast %c1_i32_56 : i32 to vector<1x512xi32>
    %149 = arith.addi %3, %148 : vector<1x512xi32>
    %c16_i32_57 = arith.constant 16 : i32
    %150 = vector.broadcast %c16_i32_57 : i32 to vector<1x512xi32>
    %151 = arith.cmpi slt, %149, %150 : vector<1x512xi32>
    %152 = arith.andi %147, %151 : vector<1x512xi1>
    %cst_58 = arith.constant 0.000000e+00 : f32
    %153 = vector.shape_cast %152 : vector<1x512xi1> to vector<1x512xi1>
    %154 = vector.broadcast %153 : vector<1x512xi1> to vector<8x512xi1>
    %155 = vector.broadcast %cst_58 : f32 to vector<8x512xf32>
    %156 = arith.select %154, %133, %155 : vector<8x512xi1>, vector<8x512xf32>
    %c496_i32 = arith.constant 496 : i32
    %157 = tpu.dynamic_rotate %0 by %c496_i32 dim 1 : vector<8x512xf32>, i32 -> vector<8x512xf32>
    %c0_i32_59 = arith.constant 0 : i32
    %158 = vector.broadcast %c0_i32_59 : i32 to vector<1x512xi32>
    %159 = arith.addi %2, %158 : vector<1x512xi32>
    %c0_i32_60 = arith.constant 0 : i32
    %160 = vector.broadcast %c0_i32_60 : i32 to vector<1x512xi32>
    %161 = arith.cmpi sge, %159, %160 : vector<1x512xi32>
    %c0_i32_61 = arith.constant 0 : i32
    %162 = vector.broadcast %c0_i32_61 : i32 to vector<1x512xi32>
    %163 = arith.addi %2, %162 : vector<1x512xi32>
    %c16_i32_62 = arith.constant 16 : i32
    %164 = vector.broadcast %c16_i32_62 : i32 to vector<1x512xi32>
    %165 = arith.cmpi slt, %163, %164 : vector<1x512xi32>
    %166 = arith.andi %161, %165 : vector<1x512xi1>
    %c1_i32_63 = arith.constant 1 : i32
    %167 = vector.broadcast %c1_i32_63 : i32 to vector<1x512xi32>
    %168 = arith.addi %3, %167 : vector<1x512xi32>
    %c0_i32_64 = arith.constant 0 : i32
    %169 = vector.broadcast %c0_i32_64 : i32 to vector<1x512xi32>
    %170 = arith.cmpi sge, %168, %169 : vector<1x512xi32>
    %171 = arith.andi %166, %170 : vector<1x512xi1>
    %c1_i32_65 = arith.constant 1 : i32
    %172 = vector.broadcast %c1_i32_65 : i32 to vector<1x512xi32>
    %173 = arith.addi %3, %172 : vector<1x512xi32>
    %c16_i32_66 = arith.constant 16 : i32
    %174 = vector.broadcast %c16_i32_66 : i32 to vector<1x512xi32>
    %175 = arith.cmpi slt, %173, %174 : vector<1x512xi32>
    %176 = arith.andi %171, %175 : vector<1x512xi1>
    %cst_67 = arith.constant 0.000000e+00 : f32
    %177 = vector.shape_cast %176 : vector<1x512xi1> to vector<1x512xi1>
    %178 = vector.broadcast %177 : vector<1x512xi1> to vector<8x512xi1>
    %179 = vector.broadcast %cst_67 : f32 to vector<8x512xf32>
    %180 = arith.select %178, %157, %179 : vector<8x512xi1>, vector<8x512xf32>
    %c495_i32 = arith.constant 495 : i32
    %181 = tpu.dynamic_rotate %0 by %c495_i32 dim 1 : vector<8x512xf32>, i32 -> vector<8x512xf32>
    %c1_i32_68 = arith.constant 1 : i32
    %182 = vector.broadcast %c1_i32_68 : i32 to vector<1x512xi32>
    %183 = arith.addi %2, %182 : vector<1x512xi32>
    %c0_i32_69 = arith.constant 0 : i32
    %184 = vector.broadcast %c0_i32_69 : i32 to vector<1x512xi32>
    %185 = arith.cmpi sge, %183, %184 : vector<1x512xi32>
    %c1_i32_70 = arith.constant 1 : i32
    %186 = vector.broadcast %c1_i32_70 : i32 to vector<1x512xi32>
    %187 = arith.addi %2, %186 : vector<1x512xi32>
    %c16_i32_71 = arith.constant 16 : i32
    %188 = vector.broadcast %c16_i32_71 : i32 to vector<1x512xi32>
    %189 = arith.cmpi slt, %187, %188 : vector<1x512xi32>
    %190 = arith.andi %185, %189 : vector<1x512xi1>
    %c1_i32_72 = arith.constant 1 : i32
    %191 = vector.broadcast %c1_i32_72 : i32 to vector<1x512xi32>
    %192 = arith.addi %3, %191 : vector<1x512xi32>
    %c0_i32_73 = arith.constant 0 : i32
    %193 = vector.broadcast %c0_i32_73 : i32 to vector<1x512xi32>
    %194 = arith.cmpi sge, %192, %193 : vector<1x512xi32>
    %195 = arith.andi %190, %194 : vector<1x512xi1>
    %c1_i32_74 = arith.constant 1 : i32
    %196 = vector.broadcast %c1_i32_74 : i32 to vector<1x512xi32>
    %197 = arith.addi %3, %196 : vector<1x512xi32>
    %c16_i32_75 = arith.constant 16 : i32
    %198 = vector.broadcast %c16_i32_75 : i32 to vector<1x512xi32>
    %199 = arith.cmpi slt, %197, %198 : vector<1x512xi32>
    %200 = arith.andi %195, %199 : vector<1x512xi1>
    %cst_76 = arith.constant 0.000000e+00 : f32
    %201 = vector.shape_cast %200 : vector<1x512xi1> to vector<1x512xi1>
    %202 = vector.broadcast %201 : vector<1x512xi1> to vector<8x512xi1>
    %203 = vector.broadcast %cst_76 : f32 to vector<8x512xf32>
    %204 = arith.select %202, %181, %203 : vector<8x512xi1>, vector<8x512xf32>
    %205 = tpu.concatenate %36, %60, %84, %108, %0, %132, %156, %180, %204 in 0 : vector<8x512xf32>, vector<8x512xf32>, vector<8x512xf32>, vector<8x512xf32>, vector<8x512xf32>, vector<8x512xf32>, vector<8x512xf32>, vector<8x512xf32>, vector<8x512xf32> -> vector<72x512xf32>
    %cst_77 = arith.constant dense<0.000000e+00> : vector<8x512xf32>
    %206 = tpu.matmul %12, %205, %cst_77 {dimension_numbers = #tpu.dot_dimension_numbers<[1], [0], [0], [1], [0, 0, 1, 1], [], []>} : vector<8x72xf32>, vector<72x512xf32>, vector<8x512xf32> -> vector<8x512xf32>
    %207 = vector.broadcast %4 : vector<8x1xf32> to vector<8x512xf32>
    %208 = arith.addf %206, %207 : vector<8x512xf32>
    %cst_78 = arith.constant dense<0.000000e+00> : vector<8xf32>
    %209 = vector.multi_reduction <add>, %208, %cst_78 [1] : vector<8x512xf32> to vector<8xf32>
    %210 = vector.shape_cast %209 : vector<8xf32> to vector<8x1xf32>
    %211 = arith.mulf %208, %208 : vector<8x512xf32>
    %cst_79 = arith.constant dense<0.000000e+00> : vector<8xf32>
    %212 = vector.multi_reduction <add>, %211, %cst_79 [1] : vector<8x512xf32> to vector<8xf32>
    %213 = vector.shape_cast %212 : vector<8xf32> to vector<8x1xf32>
    %cst_80 = arith.constant 0.001953125 : f32
    %214 = vector.broadcast %cst_80 : f32 to vector<8x1xf32>
    %215 = arith.mulf %210, %214 : vector<8x1xf32>
    %cst_81 = arith.constant 0.001953125 : f32
    %216 = vector.broadcast %cst_81 : f32 to vector<8x1xf32>
    %217 = arith.mulf %213, %216 : vector<8x1xf32>
    %218 = arith.mulf %215, %215 : vector<8x1xf32>
    %219 = arith.subf %217, %218 : vector<8x1xf32>
    %220 = vector.broadcast %215 : vector<8x1xf32> to vector<8x512xf32>
    %221 = arith.subf %208, %220 : vector<8x512xf32>
    %cst_82 = arith.constant 9.99999974E-6 : f32
    %222 = vector.broadcast %cst_82 : f32 to vector<8x1xf32>
    %223 = arith.addf %219, %222 : vector<8x1xf32>
    %224 = math.rsqrt %223 : vector<8x1xf32>
    %225 = vector.broadcast %224 : vector<8x1xf32> to vector<8x512xf32>
    %226 = arith.mulf %221, %225 : vector<8x512xf32>
    %227 = vector.broadcast %5 : vector<8x1xf32> to vector<8x512xf32>
    %228 = arith.mulf %226, %227 : vector<8x512xf32>
    %229 = vector.broadcast %6 : vector<8x1xf32> to vector<8x512xf32>
    %230 = arith.addf %228, %229 : vector<8x512xf32>
    %cst_83 = arith.constant 0.000000e+00 : f32
    %231 = vector.broadcast %cst_83 : f32 to vector<8x512xf32>
    %232 = arith.maximumf %230, %231 : vector<8x512xf32>
    %c0_84 = arith.constant 0 : index
    %c0_85 = arith.constant 0 : index
    %233 = vector.load %arg2[%c0_84, %c0_85] : memref<8x72xf32, #tpu.memory_space<vmem>>, vector<8x72xf32>
    %c17_i32_86 = arith.constant 17 : i32
    %234 = tpu.dynamic_rotate %232 by %c17_i32_86 dim 1 : vector<8x512xf32>, i32 -> vector<8x512xf32>
    %c-1_i32_87 = arith.constant -1 : i32
    %235 = vector.broadcast %c-1_i32_87 : i32 to vector<1x512xi32>
    %236 = arith.addi %2, %235 : vector<1x512xi32>
    %c0_i32_88 = arith.constant 0 : i32
    %237 = vector.broadcast %c0_i32_88 : i32 to vector<1x512xi32>
    %238 = arith.cmpi sge, %236, %237 : vector<1x512xi32>
    %c-1_i32_89 = arith.constant -1 : i32
    %239 = vector.broadcast %c-1_i32_89 : i32 to vector<1x512xi32>
    %240 = arith.addi %2, %239 : vector<1x512xi32>
    %c16_i32_90 = arith.constant 16 : i32
    %241 = vector.broadcast %c16_i32_90 : i32 to vector<1x512xi32>
    %242 = arith.cmpi slt, %240, %241 : vector<1x512xi32>
    %243 = arith.andi %238, %242 : vector<1x512xi1>
    %c-1_i32_91 = arith.constant -1 : i32
    %244 = vector.broadcast %c-1_i32_91 : i32 to vector<1x512xi32>
    %245 = arith.addi %3, %244 : vector<1x512xi32>
    %c0_i32_92 = arith.constant 0 : i32
    %246 = vector.broadcast %c0_i32_92 : i32 to vector<1x512xi32>
    %247 = arith.cmpi sge, %245, %246 : vector<1x512xi32>
    %248 = arith.andi %243, %247 : vector<1x512xi1>
    %c-1_i32_93 = arith.constant -1 : i32
    %249 = vector.broadcast %c-1_i32_93 : i32 to vector<1x512xi32>
    %250 = arith.addi %3, %249 : vector<1x512xi32>
    %c16_i32_94 = arith.constant 16 : i32
    %251 = vector.broadcast %c16_i32_94 : i32 to vector<1x512xi32>
    %252 = arith.cmpi slt, %250, %251 : vector<1x512xi32>
    %253 = arith.andi %248, %252 : vector<1x512xi1>
    %cst_95 = arith.constant 0.000000e+00 : f32
    %254 = vector.shape_cast %253 : vector<1x512xi1> to vector<1x512xi1>
    %255 = vector.broadcast %254 : vector<1x512xi1> to vector<8x512xi1>
    %256 = vector.broadcast %cst_95 : f32 to vector<8x512xf32>
    %257 = arith.select %255, %234, %256 : vector<8x512xi1>, vector<8x512xf32>
    %c16_i32_96 = arith.constant 16 : i32
    %258 = tpu.dynamic_rotate %232 by %c16_i32_96 dim 1 : vector<8x512xf32>, i32 -> vector<8x512xf32>
    %c0_i32_97 = arith.constant 0 : i32
    %259 = vector.broadcast %c0_i32_97 : i32 to vector<1x512xi32>
    %260 = arith.addi %2, %259 : vector<1x512xi32>
    %c0_i32_98 = arith.constant 0 : i32
    %261 = vector.broadcast %c0_i32_98 : i32 to vector<1x512xi32>
    %262 = arith.cmpi sge, %260, %261 : vector<1x512xi32>
    %c0_i32_99 = arith.constant 0 : i32
    %263 = vector.broadcast %c0_i32_99 : i32 to vector<1x512xi32>
    %264 = arith.addi %2, %263 : vector<1x512xi32>
    %c16_i32_100 = arith.constant 16 : i32
    %265 = vector.broadcast %c16_i32_100 : i32 to vector<1x512xi32>
    %266 = arith.cmpi slt, %264, %265 : vector<1x512xi32>
    %267 = arith.andi %262, %266 : vector<1x512xi1>
    %c-1_i32_101 = arith.constant -1 : i32
    %268 = vector.broadcast %c-1_i32_101 : i32 to vector<1x512xi32>
    %269 = arith.addi %3, %268 : vector<1x512xi32>
    %c0_i32_102 = arith.constant 0 : i32
    %270 = vector.broadcast %c0_i32_102 : i32 to vector<1x512xi32>
    %271 = arith.cmpi sge, %269, %270 : vector<1x512xi32>
    %272 = arith.andi %267, %271 : vector<1x512xi1>
    %c-1_i32_103 = arith.constant -1 : i32
    %273 = vector.broadcast %c-1_i32_103 : i32 to vector<1x512xi32>
    %274 = arith.addi %3, %273 : vector<1x512xi32>
    %c16_i32_104 = arith.constant 16 : i32
    %275 = vector.broadcast %c16_i32_104 : i32 to vector<1x512xi32>
    %276 = arith.cmpi slt, %274, %275 : vector<1x512xi32>
    %277 = arith.andi %272, %276 : vector<1x512xi1>
    %cst_105 = arith.constant 0.000000e+00 : f32
    %278 = vector.shape_cast %277 : vector<1x512xi1> to vector<1x512xi1>
    %279 = vector.broadcast %278 : vector<1x512xi1> to vector<8x512xi1>
    %280 = vector.broadcast %cst_105 : f32 to vector<8x512xf32>
    %281 = arith.select %279, %258, %280 : vector<8x512xi1>, vector<8x512xf32>
    %c15_i32_106 = arith.constant 15 : i32
    %282 = tpu.dynamic_rotate %232 by %c15_i32_106 dim 1 : vector<8x512xf32>, i32 -> vector<8x512xf32>
    %c1_i32_107 = arith.constant 1 : i32
    %283 = vector.broadcast %c1_i32_107 : i32 to vector<1x512xi32>
    %284 = arith.addi %2, %283 : vector<1x512xi32>
    %c0_i32_108 = arith.constant 0 : i32
    %285 = vector.broadcast %c0_i32_108 : i32 to vector<1x512xi32>
    %286 = arith.cmpi sge, %284, %285 : vector<1x512xi32>
    %c1_i32_109 = arith.constant 1 : i32
    %287 = vector.broadcast %c1_i32_109 : i32 to vector<1x512xi32>
    %288 = arith.addi %2, %287 : vector<1x512xi32>
    %c16_i32_110 = arith.constant 16 : i32
    %289 = vector.broadcast %c16_i32_110 : i32 to vector<1x512xi32>
    %290 = arith.cmpi slt, %288, %289 : vector<1x512xi32>
    %291 = arith.andi %286, %290 : vector<1x512xi1>
    %c-1_i32_111 = arith.constant -1 : i32
    %292 = vector.broadcast %c-1_i32_111 : i32 to vector<1x512xi32>
    %293 = arith.addi %3, %292 : vector<1x512xi32>
    %c0_i32_112 = arith.constant 0 : i32
    %294 = vector.broadcast %c0_i32_112 : i32 to vector<1x512xi32>
    %295 = arith.cmpi sge, %293, %294 : vector<1x512xi32>
    %296 = arith.andi %291, %295 : vector<1x512xi1>
    %c-1_i32_113 = arith.constant -1 : i32
    %297 = vector.broadcast %c-1_i32_113 : i32 to vector<1x512xi32>
    %298 = arith.addi %3, %297 : vector<1x512xi32>
    %c16_i32_114 = arith.constant 16 : i32
    %299 = vector.broadcast %c16_i32_114 : i32 to vector<1x512xi32>
    %300 = arith.cmpi slt, %298, %299 : vector<1x512xi32>
    %301 = arith.andi %296, %300 : vector<1x512xi1>
    %cst_115 = arith.constant 0.000000e+00 : f32
    %302 = vector.shape_cast %301 : vector<1x512xi1> to vector<1x512xi1>
    %303 = vector.broadcast %302 : vector<1x512xi1> to vector<8x512xi1>
    %304 = vector.broadcast %cst_115 : f32 to vector<8x512xf32>
    %305 = arith.select %303, %282, %304 : vector<8x512xi1>, vector<8x512xf32>
    %c1_i32_116 = arith.constant 1 : i32
    %306 = tpu.dynamic_rotate %232 by %c1_i32_116 dim 1 : vector<8x512xf32>, i32 -> vector<8x512xf32>
    %c-1_i32_117 = arith.constant -1 : i32
    %307 = vector.broadcast %c-1_i32_117 : i32 to vector<1x512xi32>
    %308 = arith.addi %2, %307 : vector<1x512xi32>
    %c0_i32_118 = arith.constant 0 : i32
    %309 = vector.broadcast %c0_i32_118 : i32 to vector<1x512xi32>
    %310 = arith.cmpi sge, %308, %309 : vector<1x512xi32>
    %c-1_i32_119 = arith.constant -1 : i32
    %311 = vector.broadcast %c-1_i32_119 : i32 to vector<1x512xi32>
    %312 = arith.addi %2, %311 : vector<1x512xi32>
    %c16_i32_120 = arith.constant 16 : i32
    %313 = vector.broadcast %c16_i32_120 : i32 to vector<1x512xi32>
    %314 = arith.cmpi slt, %312, %313 : vector<1x512xi32>
    %315 = arith.andi %310, %314 : vector<1x512xi1>
    %c0_i32_121 = arith.constant 0 : i32
    %316 = vector.broadcast %c0_i32_121 : i32 to vector<1x512xi32>
    %317 = arith.addi %3, %316 : vector<1x512xi32>
    %c0_i32_122 = arith.constant 0 : i32
    %318 = vector.broadcast %c0_i32_122 : i32 to vector<1x512xi32>
    %319 = arith.cmpi sge, %317, %318 : vector<1x512xi32>
    %320 = arith.andi %315, %319 : vector<1x512xi1>
    %c0_i32_123 = arith.constant 0 : i32
    %321 = vector.broadcast %c0_i32_123 : i32 to vector<1x512xi32>
    %322 = arith.addi %3, %321 : vector<1x512xi32>
    %c16_i32_124 = arith.constant 16 : i32
    %323 = vector.broadcast %c16_i32_124 : i32 to vector<1x512xi32>
    %324 = arith.cmpi slt, %322, %323 : vector<1x512xi32>
    %325 = arith.andi %320, %324 : vector<1x512xi1>
    %cst_125 = arith.constant 0.000000e+00 : f32
    %326 = vector.shape_cast %325 : vector<1x512xi1> to vector<1x512xi1>
    %327 = vector.broadcast %326 : vector<1x512xi1> to vector<8x512xi1>
    %328 = vector.broadcast %cst_125 : f32 to vector<8x512xf32>
    %329 = arith.select %327, %306, %328 : vector<8x512xi1>, vector<8x512xf32>
    %c511_i32_126 = arith.constant 511 : i32
    %330 = tpu.dynamic_rotate %232 by %c511_i32_126 dim 1 : vector<8x512xf32>, i32 -> vector<8x512xf32>
    %c1_i32_127 = arith.constant 1 : i32
    %331 = vector.broadcast %c1_i32_127 : i32 to vector<1x512xi32>
    %332 = arith.addi %2, %331 : vector<1x512xi32>
    %c0_i32_128 = arith.constant 0 : i32
    %333 = vector.broadcast %c0_i32_128 : i32 to vector<1x512xi32>
    %334 = arith.cmpi sge, %332, %333 : vector<1x512xi32>
    %c1_i32_129 = arith.constant 1 : i32
    %335 = vector.broadcast %c1_i32_129 : i32 to vector<1x512xi32>
    %336 = arith.addi %2, %335 : vector<1x512xi32>
    %c16_i32_130 = arith.constant 16 : i32
    %337 = vector.broadcast %c16_i32_130 : i32 to vector<1x512xi32>
    %338 = arith.cmpi slt, %336, %337 : vector<1x512xi32>
    %339 = arith.andi %334, %338 : vector<1x512xi1>
    %c0_i32_131 = arith.constant 0 : i32
    %340 = vector.broadcast %c0_i32_131 : i32 to vector<1x512xi32>
    %341 = arith.addi %3, %340 : vector<1x512xi32>
    %c0_i32_132 = arith.constant 0 : i32
    %342 = vector.broadcast %c0_i32_132 : i32 to vector<1x512xi32>
    %343 = arith.cmpi sge, %341, %342 : vector<1x512xi32>
    %344 = arith.andi %339, %343 : vector<1x512xi1>
    %c0_i32_133 = arith.constant 0 : i32
    %345 = vector.broadcast %c0_i32_133 : i32 to vector<1x512xi32>
    %346 = arith.addi %3, %345 : vector<1x512xi32>
    %c16_i32_134 = arith.constant 16 : i32
    %347 = vector.broadcast %c16_i32_134 : i32 to vector<1x512xi32>
    %348 = arith.cmpi slt, %346, %347 : vector<1x512xi32>
    %349 = arith.andi %344, %348 : vector<1x512xi1>
    %cst_135 = arith.constant 0.000000e+00 : f32
    %350 = vector.shape_cast %349 : vector<1x512xi1> to vector<1x512xi1>
    %351 = vector.broadcast %350 : vector<1x512xi1> to vector<8x512xi1>
    %352 = vector.broadcast %cst_135 : f32 to vector<8x512xf32>
    %353 = arith.select %351, %330, %352 : vector<8x512xi1>, vector<8x512xf32>
    %c497_i32_136 = arith.constant 497 : i32
    %354 = tpu.dynamic_rotate %232 by %c497_i32_136 dim 1 : vector<8x512xf32>, i32 -> vector<8x512xf32>
    %c-1_i32_137 = arith.constant -1 : i32
    %355 = vector.broadcast %c-1_i32_137 : i32 to vector<1x512xi32>
    %356 = arith.addi %2, %355 : vector<1x512xi32>
    %c0_i32_138 = arith.constant 0 : i32
    %357 = vector.broadcast %c0_i32_138 : i32 to vector<1x512xi32>
    %358 = arith.cmpi sge, %356, %357 : vector<1x512xi32>
    %c-1_i32_139 = arith.constant -1 : i32
    %359 = vector.broadcast %c-1_i32_139 : i32 to vector<1x512xi32>
    %360 = arith.addi %2, %359 : vector<1x512xi32>
    %c16_i32_140 = arith.constant 16 : i32
    %361 = vector.broadcast %c16_i32_140 : i32 to vector<1x512xi32>
    %362 = arith.cmpi slt, %360, %361 : vector<1x512xi32>
    %363 = arith.andi %358, %362 : vector<1x512xi1>
    %c1_i32_141 = arith.constant 1 : i32
    %364 = vector.broadcast %c1_i32_141 : i32 to vector<1x512xi32>
    %365 = arith.addi %3, %364 : vector<1x512xi32>
    %c0_i32_142 = arith.constant 0 : i32
    %366 = vector.broadcast %c0_i32_142 : i32 to vector<1x512xi32>
    %367 = arith.cmpi sge, %365, %366 : vector<1x512xi32>
    %368 = arith.andi %363, %367 : vector<1x512xi1>
    %c1_i32_143 = arith.constant 1 : i32
    %369 = vector.broadcast %c1_i32_143 : i32 to vector<1x512xi32>
    %370 = arith.addi %3, %369 : vector<1x512xi32>
    %c16_i32_144 = arith.constant 16 : i32
    %371 = vector.broadcast %c16_i32_144 : i32 to vector<1x512xi32>
    %372 = arith.cmpi slt, %370, %371 : vector<1x512xi32>
    %373 = arith.andi %368, %372 : vector<1x512xi1>
    %cst_145 = arith.constant 0.000000e+00 : f32
    %374 = vector.shape_cast %373 : vector<1x512xi1> to vector<1x512xi1>
    %375 = vector.broadcast %374 : vector<1x512xi1> to vector<8x512xi1>
    %376 = vector.broadcast %cst_145 : f32 to vector<8x512xf32>
    %377 = arith.select %375, %354, %376 : vector<8x512xi1>, vector<8x512xf32>
    %c496_i32_146 = arith.constant 496 : i32
    %378 = tpu.dynamic_rotate %232 by %c496_i32_146 dim 1 : vector<8x512xf32>, i32 -> vector<8x512xf32>
    %c0_i32_147 = arith.constant 0 : i32
    %379 = vector.broadcast %c0_i32_147 : i32 to vector<1x512xi32>
    %380 = arith.addi %2, %379 : vector<1x512xi32>
    %c0_i32_148 = arith.constant 0 : i32
    %381 = vector.broadcast %c0_i32_148 : i32 to vector<1x512xi32>
    %382 = arith.cmpi sge, %380, %381 : vector<1x512xi32>
    %c0_i32_149 = arith.constant 0 : i32
    %383 = vector.broadcast %c0_i32_149 : i32 to vector<1x512xi32>
    %384 = arith.addi %2, %383 : vector<1x512xi32>
    %c16_i32_150 = arith.constant 16 : i32
    %385 = vector.broadcast %c16_i32_150 : i32 to vector<1x512xi32>
    %386 = arith.cmpi slt, %384, %385 : vector<1x512xi32>
    %387 = arith.andi %382, %386 : vector<1x512xi1>
    %c1_i32_151 = arith.constant 1 : i32
    %388 = vector.broadcast %c1_i32_151 : i32 to vector<1x512xi32>
    %389 = arith.addi %3, %388 : vector<1x512xi32>
    %c0_i32_152 = arith.constant 0 : i32
    %390 = vector.broadcast %c0_i32_152 : i32 to vector<1x512xi32>
    %391 = arith.cmpi sge, %389, %390 : vector<1x512xi32>
    %392 = arith.andi %387, %391 : vector<1x512xi1>
    %c1_i32_153 = arith.constant 1 : i32
    %393 = vector.broadcast %c1_i32_153 : i32 to vector<1x512xi32>
    %394 = arith.addi %3, %393 : vector<1x512xi32>
    %c16_i32_154 = arith.constant 16 : i32
    %395 = vector.broadcast %c16_i32_154 : i32 to vector<1x512xi32>
    %396 = arith.cmpi slt, %394, %395 : vector<1x512xi32>
    %397 = arith.andi %392, %396 : vector<1x512xi1>
    %cst_155 = arith.constant 0.000000e+00 : f32
    %398 = vector.shape_cast %397 : vector<1x512xi1> to vector<1x512xi1>
    %399 = vector.broadcast %398 : vector<1x512xi1> to vector<8x512xi1>
    %400 = vector.broadcast %cst_155 : f32 to vector<8x512xf32>
    %401 = arith.select %399, %378, %400 : vector<8x512xi1>, vector<8x512xf32>
    %c495_i32_156 = arith.constant 495 : i32
    %402 = tpu.dynamic_rotate %232 by %c495_i32_156 dim 1 : vector<8x512xf32>, i32 -> vector<8x512xf32>
    %c1_i32_157 = arith.constant 1 : i32
    %403 = vector.broadcast %c1_i32_157 : i32 to vector<1x512xi32>
    %404 = arith.addi %2, %403 : vector<1x512xi32>
    %c0_i32_158 = arith.constant 0 : i32
    %405 = vector.broadcast %c0_i32_158 : i32 to vector<1x512xi32>
    %406 = arith.cmpi sge, %404, %405 : vector<1x512xi32>
    %c1_i32_159 = arith.constant 1 : i32
    %407 = vector.broadcast %c1_i32_159 : i32 to vector<1x512xi32>
    %408 = arith.addi %2, %407 : vector<1x512xi32>
    %c16_i32_160 = arith.constant 16 : i32
    %409 = vector.broadcast %c16_i32_160 : i32 to vector<1x512xi32>
    %410 = arith.cmpi slt, %408, %409 : vector<1x512xi32>
    %411 = arith.andi %406, %410 : vector<1x512xi1>
    %c1_i32_161 = arith.constant 1 : i32
    %412 = vector.broadcast %c1_i32_161 : i32 to vector<1x512xi32>
    %413 = arith.addi %3, %412 : vector<1x512xi32>
    %c0_i32_162 = arith.constant 0 : i32
    %414 = vector.broadcast %c0_i32_162 : i32 to vector<1x512xi32>
    %415 = arith.cmpi sge, %413, %414 : vector<1x512xi32>
    %416 = arith.andi %411, %415 : vector<1x512xi1>
    %c1_i32_163 = arith.constant 1 : i32
    %417 = vector.broadcast %c1_i32_163 : i32 to vector<1x512xi32>
    %418 = arith.addi %3, %417 : vector<1x512xi32>
    %c16_i32_164 = arith.constant 16 : i32
    %419 = vector.broadcast %c16_i32_164 : i32 to vector<1x512xi32>
    %420 = arith.cmpi slt, %418, %419 : vector<1x512xi32>
    %421 = arith.andi %416, %420 : vector<1x512xi1>
    %cst_165 = arith.constant 0.000000e+00 : f32
    %422 = vector.shape_cast %421 : vector<1x512xi1> to vector<1x512xi1>
    %423 = vector.broadcast %422 : vector<1x512xi1> to vector<8x512xi1>
    %424 = vector.broadcast %cst_165 : f32 to vector<8x512xf32>
    %425 = arith.select %423, %402, %424 : vector<8x512xi1>, vector<8x512xf32>
    %426 = tpu.concatenate %257, %281, %305, %329, %232, %353, %377, %401, %425 in 0 : vector<8x512xf32>, vector<8x512xf32>, vector<8x512xf32>, vector<8x512xf32>, vector<8x512xf32>, vector<8x512xf32>, vector<8x512xf32>, vector<8x512xf32>, vector<8x512xf32> -> vector<72x512xf32>
    %cst_166 = arith.constant dense<0.000000e+00> : vector<8x512xf32>
    %427 = tpu.matmul %233, %426, %cst_166 {dimension_numbers = #tpu.dot_dimension_numbers<[1], [0], [0], [1], [0, 0, 1, 1], [], []>} : vector<8x72xf32>, vector<72x512xf32>, vector<8x512xf32> -> vector<8x512xf32>
    %428 = vector.broadcast %7 : vector<8x1xf32> to vector<8x512xf32>
    %429 = arith.addf %427, %428 : vector<8x512xf32>
    %cst_167 = arith.constant dense<0.000000e+00> : vector<8xf32>
    %430 = vector.multi_reduction <add>, %429, %cst_167 [1] : vector<8x512xf32> to vector<8xf32>
    %431 = vector.shape_cast %430 : vector<8xf32> to vector<8x1xf32>
    %432 = arith.mulf %429, %429 : vector<8x512xf32>
    %cst_168 = arith.constant dense<0.000000e+00> : vector<8xf32>
    %433 = vector.multi_reduction <add>, %432, %cst_168 [1] : vector<8x512xf32> to vector<8xf32>
    %434 = vector.shape_cast %433 : vector<8xf32> to vector<8x1xf32>
    %cst_169 = arith.constant 0.001953125 : f32
    %435 = vector.broadcast %cst_169 : f32 to vector<8x1xf32>
    %436 = arith.mulf %431, %435 : vector<8x1xf32>
    %cst_170 = arith.constant 0.001953125 : f32
    %437 = vector.broadcast %cst_170 : f32 to vector<8x1xf32>
    %438 = arith.mulf %434, %437 : vector<8x1xf32>
    %439 = arith.mulf %436, %436 : vector<8x1xf32>
    %440 = arith.subf %438, %439 : vector<8x1xf32>
    %441 = vector.broadcast %436 : vector<8x1xf32> to vector<8x512xf32>
    %442 = arith.subf %429, %441 : vector<8x512xf32>
    %cst_171 = arith.constant 9.99999974E-6 : f32
    %443 = vector.broadcast %cst_171 : f32 to vector<8x1xf32>
    %444 = arith.addf %440, %443 : vector<8x1xf32>
    %445 = math.rsqrt %444 : vector<8x1xf32>
    %446 = vector.broadcast %445 : vector<8x1xf32> to vector<8x512xf32>
    %447 = arith.mulf %442, %446 : vector<8x512xf32>
    %448 = vector.broadcast %8 : vector<8x1xf32> to vector<8x512xf32>
    %449 = arith.mulf %447, %448 : vector<8x512xf32>
    %450 = vector.broadcast %9 : vector<8x1xf32> to vector<8x512xf32>
    %451 = arith.addf %449, %450 : vector<8x512xf32>
    %452 = vector.extract_strided_slice %0 {offsets = [0, 0], sizes = [4, 512], strides = [1, 1]} : vector<8x512xf32> to vector<4x512xf32>
    %cst_172 = arith.constant dense<0.000000e+00> : vector<4xf32>
    %453 = vector.multi_reduction <add>, %452, %cst_172 [1] : vector<4x512xf32> to vector<4xf32>
    %454 = vector.shape_cast %453 : vector<4xf32> to vector<4x1xf32>
    %455 = arith.mulf %452, %452 : vector<4x512xf32>
    %cst_173 = arith.constant dense<0.000000e+00> : vector<4xf32>
    %456 = vector.multi_reduction <add>, %455, %cst_173 [1] : vector<4x512xf32> to vector<4xf32>
    %457 = vector.shape_cast %456 : vector<4xf32> to vector<4x1xf32>
    %cst_174 = arith.constant 0.001953125 : f32
    %458 = vector.broadcast %cst_174 : f32 to vector<4x1xf32>
    %459 = arith.mulf %454, %458 : vector<4x1xf32>
    %cst_175 = arith.constant 0.001953125 : f32
    %460 = vector.broadcast %cst_175 : f32 to vector<4x1xf32>
    %461 = arith.mulf %457, %460 : vector<4x1xf32>
    %462 = arith.mulf %459, %459 : vector<4x1xf32>
    %463 = arith.subf %461, %462 : vector<4x1xf32>
    %464 = vector.broadcast %459 : vector<4x1xf32> to vector<4x512xf32>
    %465 = arith.subf %452, %464 : vector<4x512xf32>
    %cst_176 = arith.constant 9.99999974E-6 : f32
    %466 = vector.broadcast %cst_176 : f32 to vector<4x1xf32>
    %467 = arith.addf %463, %466 : vector<4x1xf32>
    %468 = math.rsqrt %467 : vector<4x1xf32>
    %469 = vector.broadcast %468 : vector<4x1xf32> to vector<4x512xf32>
    %470 = arith.mulf %465, %469 : vector<4x512xf32>
    %471 = vector.broadcast %10 : vector<4x1xf32> to vector<4x512xf32>
    %472 = arith.mulf %470, %471 : vector<4x512xf32>
    %473 = vector.broadcast %11 : vector<4x1xf32> to vector<4x512xf32>
    %474 = arith.addf %472, %473 : vector<4x512xf32>
    %475 = tpu.concatenate %451, %474 in 0 : vector<8x512xf32>, vector<4x512xf32> -> vector<12x512xf32>
    %cst_177 = arith.constant 0.000000e+00 : f32
    %476 = vector.broadcast %cst_177 : f32 to vector<12x512xf32>
    %477 = arith.maximumf %475, %476 : vector<12x512xf32>
    %c511_i32_178 = arith.constant 511 : i32
    %478 = tpu.dynamic_rotate %477 by %c511_i32_178 dim 1 : vector<12x512xf32>, i32 -> vector<12x512xf32>
    %479 = arith.maximumf %477, %478 : vector<12x512xf32>
    %c496_i32_179 = arith.constant 496 : i32
    %480 = tpu.dynamic_rotate %479 by %c496_i32_179 dim 1 : vector<12x512xf32>, i32 -> vector<12x512xf32>
    %481 = arith.maximumf %479, %480 : vector<12x512xf32>
    %482 = tpu.iota {dimensions = array<i32: 0>} : vector<512x128xi32>
    %c0_180 = arith.constant 0 : index
    %c0_181 = arith.constant 0 : index
    %483 = vector.load %arg5[%c0_180, %c0_181] : memref<1x128xi32, #tpu.memory_space<vmem>>, vector<1x128xi32>
    %484 = vector.broadcast %483 : vector<1x128xi32> to vector<512x128xi32>
    %485 = arith.cmpi eq, %482, %484 : vector<512x128xi32>
    %486 = arith.extui %485 : vector<512x128xi1> to vector<512x128xi32>
    %487 = arith.sitofp %486 : vector<512x128xi32> to vector<512x128xf32>
    %488 = arith.truncf %481 : vector<12x512xf32> to vector<12x512xbf16>
    %489 = arith.extf %488 : vector<12x512xbf16> to vector<12x512xf32>
    %490 = arith.subf %481, %489 : vector<12x512xf32>
    %cst_182 = arith.constant dense<0.000000e+00> : vector<12x128xf32>
    %491 = tpu.matmul %489, %487, %cst_182 {dimension_numbers = #tpu.dot_dimension_numbers<[1], [0], [0], [1], [0, 0, 1, 1], [], []>} : vector<12x512xf32>, vector<512x128xf32>, vector<12x128xf32> -> vector<12x128xf32>
    %cst_183 = arith.constant dense<0.000000e+00> : vector<12x128xf32>
    %492 = tpu.matmul %490, %487, %cst_183 {dimension_numbers = #tpu.dot_dimension_numbers<[1], [0], [0], [1], [0, 0, 1, 1], [], []>} : vector<12x512xf32>, vector<512x128xf32>, vector<12x128xf32> -> vector<12x128xf32>
    %493 = arith.addf %491, %492 : vector<12x128xf32>
    %c0_184 = arith.constant 0 : index
    %c0_185 = arith.constant 0 : index
    %494 = vector.load %arg6[%c0_184, %c0_185] : memref<12x128xf32, #tpu.memory_space<vmem>>, vector<12x128xf32>
    tpu.vector_store %arg6[%c0_184, %c0_185], %493 {strides = array<i32>} : memref<12x128xf32, #tpu.memory_space<vmem>>, vector<12x128xf32>,
    return
  }
}

</mosaic_0001>

<bundles_post_ra>
// kernel: residual_concat_block.1
= control target key start
LH: loop header
LB: loop body
LE: loop exit
PB: predicated region body
PF: predicated region fallthrough
CT: control target
= control target key end

     0   :  { %v2424_v3 = vmov 0   ;;  %s2425_s29 = smov 17   ;;  %s2426_s30 = smov 16   ;;  %v2432_v9 = vmov 0.0   ;;  %v40_v18 = vlaneseq  ;;  %v4015_v20 = vmov 0  ;;  %s3942_s0 = inlined_call_operand.vmem [shape: f32[8,512], index: 0, kind: input, shape index: {}]   ;;  %s3943_s3 = inlined_call_operand.vmem [shape: f32[8,8], index: 3, kind: input, shape index: {}]   ;;  %s3944_s4 = inlined_call_operand.vmem [shape: s32[2,512], index: 4, kind: input, shape index: {}]   ;;  %s3945_s1 = inlined_call_operand.vmem [shape: f32[8,72], index: 1, kind: input, shape index: {}]   ;;  %s3946_s2 = inlined_call_operand.vmem [shape: f32[8,72], index: 2, kind: input, shape index: {}]   ;;  %s3947_s5 = inlined_call_operand.vmem [shape: s32[1,128], index: 5, kind: input, shape index: {}]   ;;  %s3948_s6 = inlined_call_operand.vmem [shape: f32[12,128], index: 6, kind: output, shape index: {}]  }
   0x1   :  { %v2481_v0 = vld [vmem:[%s3942_s0 + $0x10] sm:$0xff]  ;;  %v2486_v1 = vld [vmem:[%s3942_s0 + $0x18] sm:$0xff]  ;;  %v2491_v2 = vld [vmem:[%s3942_s0] sm:$0xff]  ;;  %2334 = vset.pattern.permute.xlu0 %v2424_v3  ;;  %s2427_s7 = smov 1   ;;  %s2428_s8 = smov 15   ;;  %446 = vmatprep.mubr.f32.mxu0 %v2432_v9  ;;  %v4017_v39 = vmov 0 }
   0x2   :  { %v2274_v4 = vpack.i.bf16 %v2481_v0, %v2486_v1  ;;  %v2499_v5 = vld [vmem:[%s3942_s0 + $0x8] sm:$0xff]  ;;  %v2309_v7 = vpack.i.bf16 %v2486_v1, %v2491_v2  ;;  %s2429_s9 = smov 127   ;;  %s2430_s10 = smov 112   ;;  %517 = vmatprep.mubr.f32.mxu1 %v2432_v9  ;;  %v2534_v10 = vld [vmem:[%s3943_s3] sm:$0xff]  ;;  %v2555_v19 = vshrl.u32 %v40_v18, 7  ;;  %v2581_v26 = vand.u32 127, %v40_v18 }
   0x3   :  { %v2264_v6 = vpack.i.bf16 %v2499_v5, %v2491_v2  ;;  %v2304_v8 = vpack.i.bf16 %v2481_v0, %v2499_v5  ;;  %s2431_s11 = smov 113   ;;  %s2433_s12 = smov 111   ;;  %v28_v11 = vld [vmem:[%s3944_s4] ss:$2 sm:$0xf]  ;;  %v4019_v40 = vmov 0 }
   0x4   :  { %2275 = vrot.lane.b32.xlu1 %v2274_v4, %s2425_s29  ;;  %v1607_v12 = vld [vmem:[%s3944_s4 + $0x1] ss:$2 sm:$0xf]  ;;  %v47_v13 = vadd.s32 4294967295, %v28_v11  ;;  %vm94_vm2 = vcmp.ge.s32.totalorder %v28_v11, 0  ;;  %vm95_vm3 = vcmp.lt.s32.totalorder %v28_v11, 16 }
   0x5   :  { %2265 = vrot.lane.b32.xlu0 %v2264_v6, %s2425_s29  ;;  %v51_v14 = vadd.s32 4294967295, %v1607_v12  ;;  %v137_v15 = vadd.s32 1, %v28_v11  ;;  %vm2547_vm6 = vmand %vm94_vm2, %vm95_vm3  ;;  %4014 = vst [vmem:[#allocation2_spill] sm:$0xff] %v2555_v19  ;;  %vm181_vm14 = vcmp.ge.s32.totalorder %v1607_v12, 0  ;;  %v2566_v21 = vsub.s32 1, %v2555_v19 }
   0x6   :  { %vm48_vm0 = vcmp.ge.s32.totalorder %v47_v13, 0  ;;  %vm49_vm1 = vcmp.lt.s32.totalorder %v47_v13, 16  ;;  %v2569_v22 = vsub.s32 3, %v2555_v19  ;;  %vm183_vm2 = vcmp.lt.s32.totalorder %v1607_v12, 16 }
   0x7   :  { %vm2543_vm4 = vmand %vm48_vm0, %vm49_vm1  ;;  %vm52_vm5 = vcmp.ge.s32.totalorder %v51_v14, 0  ;;  %vm138_vm7 = vcmp.ge.s32.totalorder %v137_v15, 0  ;;  %vm139_vm8 = vcmp.lt.s32.totalorder %v137_v15, 16  ;;  %vm54_vm10 = vcmp.lt.s32.totalorder %v51_v14, 16 }
   0x8   :  { %2280 = vrot.lane.b32.xlu1 %v2274_v4, %s2426_s30  ;;  %vm53_vm9 = vmand %vm2543_vm4, %vm52_vm5  ;;  %v2576_v24 = vsub.s32 0, %v2555_v19  ;;  %v2579_v25 = vsub.s32 2, %v2555_v19  ;;  %v2585_v28 = vadd.s32 1, %v1607_v12  ;;  %v4023_v43 = vmov 0 }
   0x9   :  { %2270 = vrot.lane.b32.xlu0 %v2264_v6, %s2426_s30  ;;  %vm97_vm11 = vmand %vm2547_vm6, %vm52_vm5  ;;  %v4025_v44 = vmov 0  ;;  %v4027_v48 = vmov 0  ;;  %v4031_v54 = vmov 0  ;;  %v4033_v55 = vmov 0 }
   0xa   :  { %vm2557_vm12 = vmand %vm138_vm7, %vm139_vm8  ;;  %v4035_v56 = vmov 0  ;;  %v4037_v60 = vmov 0  ;;  %v4050_v14 = vmov 0  ;;  %v4052_v15 = vmov 0 }
   0xb   :  { %v4016_v20 = vsel %vm2557_vm12, 4294967295, %v4015_v20  ;;  %vm55_vm13 = vmand %vm53_vm9, %vm54_vm10 }
   0xc   :  { %2290 = vrot.lane.b32.xlu1 %v2264_v6, %s2427_s7  ;;  %vm98_vm15 = vmand %vm97_vm11, %vm54_vm10  ;;  %v56_v23 = vsel %vm55_vm13, 1, %v2424_v3 }
   0xd   :  { %2285 = vrot.lane.b32.xlu0 %v2264_v6, %s2428_s8  ;;  %vm141_vm0 = vmand %vm2557_vm12, %vm52_vm5  ;;  %v99_v27 = vsel %vm98_vm15, 1, %v2424_v3  ;;  %v64_v29 = vrot.slane %v56_v23, %v2566_v21  ;;  %v72_v30 = vrot.slane %v56_v23, %v2569_v22  ;;  %v60_v31 = vrot.slane %v56_v23, %v2576_v24 }
   0xe   :  { %vm182_vm1 = vmand %vm2543_vm4, %vm181_vm14  ;;  %v68_v32 = vrot.slane %v56_v23, %v2579_v25  ;;  %v107_v34 = vrot.slane %v99_v27, %v2566_v21  ;;  %v115_v36 = vrot.slane %v99_v27, %v2569_v22  ;;  %v103_v37 = vrot.slane %v99_v27, %v2576_v24 }
   0xf   :  { %vm142_vm3 = vmand %vm141_vm0, %vm54_vm10  ;;  %vm3949_vm10 = vcmp.ge.s32.totalorder %v2585_v28, 0  ;;  %v111_v38 = vrot.slane %v99_v27, %v2579_v25  ;;  %vm2606_vm11 = vcmp.eq.s32.totalorder %v64_v29, 1  ;;  %vm2610_vm13 = vcmp.eq.s32.totalorder %v72_v30, 1 }
  0x10   :  { %2300 = vrot.lane.b32.xlu1 %v2274_v4, %s2427_s7  ;;  %vm184_vm5 = vmand %vm182_vm1, %vm183_vm2  ;;  %v143_v33 = vsel %vm142_vm3, 1, %v2424_v3  ;;  %v4018_v39 = vsel %vm2606_vm11, 4294967295, %v4017_v39  ;;  %v4020_v40 = vsel %vm2610_vm13, 4294967295, %v4019_v40  ;;  %vm3954_vm15 = vcmp.lt.s32.totalorder %v2585_v28, 16 }
  0x11   :  { %2295 = vrot.lane.b32.xlu0 %v2274_v4, %s2428_s8  ;;  %vm223_vm7 = vmand %vm2557_vm12, %vm181_vm14  ;;  %v2600_v35 = vsel %vm184_vm5, 1, %v2424_v3  ;;  %v151_v41 = vrot.slane %v143_v33, %v2566_v21  ;;  %vm2621_vm0 = vcmp.eq.s32.totalorder %v60_v31, 1  ;;  %vm2625_vm1 = vcmp.eq.s32.totalorder %v68_v32, 1 }
  0x12   :  { %vm2616_vm14 = vmand %vm223_vm7, %vm183_vm2  ;;  %v4024_v43 = vsel %vm2621_vm0, 4294967295, %v4023_v43  ;;  %v4026_v44 = vsel %vm2625_vm1, 4294967295, %v4025_v44  ;;  %v193_v45 = vrot.slane %v2600_v35, %v2566_v21  ;;  %v147_v46 = vrot.slane %v143_v33, %v2576_v24 }
  0x13   :  { %vm2633_vm3 = vcmp.eq.s32.totalorder %v107_v34, 1  ;;  %v189_v49 = vrot.slane %v2600_v35, %v2576_v24  ;;  %v159_v50 = vrot.slane %v143_v33, %v2569_v22  ;;  %v201_v51 = vrot.slane %v2600_v35, %v2569_v22  ;;  %vm2646_vm5 = vmand %vm2543_vm4, %vm3949_vm10 }
  0x14   :  { %2310 = vrot.lane.b32.xlu1 %v2309_v7, %s2429_s9  ;;  %v4028_v48 = vsel %vm2633_vm3, 4294967295, %v4027_v48  ;;  %vm2651_vm2 = vcmp.eq.s32.totalorder %v115_v36, 1  ;;  %vm2655_vm9 = vcmp.eq.s32.totalorder %v103_v37, 1  ;;  %vm2659_vm8 = vcmp.eq.s32.totalorder %v111_v38, 1 }
  0x15   :  { %2305 = vrot.lane.b32.xlu0 %v2304_v8, %s2429_s9  ;;  %v4032_v54 = vsel %vm2651_vm2, 4294967295, %v4031_v54  ;;  %v4034_v55 = vsel %vm2655_vm9, 4294967295, %v4033_v55  ;;  %v4036_v56 = vsel %vm2659_vm8, 4294967295, %v4035_v56  ;;  %v2666_v57 = vsel %vm2616_vm14, 1, %v2424_v3  ;;  %vm2687_vm14 = vmand %vm2646_vm5, %vm3954_vm15 }
  0x16   :  { %vm2668_vm4 = vcmp.eq.s32.totalorder %v151_v41, 1  ;;  %v155_v61 = vrot.slane %v143_v33, %v2579_v25  ;;  %vm2673_vm7 = vcmp.eq.s32.totalorder %v193_v45, 1  ;;  %v4039_v4 = vmov 0 }
  0x17   :  { %v4038_v60 = vsel %vm2668_vm4, 4294967295, %v4037_v60  ;;  %v4040_v4 = vsel %vm2673_vm7, 4294967295, %v4039_v4  ;;  %vm2677_vm10 = vcmp.eq.s32.totalorder %v147_v46, 1  ;;  %v4041_v6 = vmov 0 }
  0x18   :  { %2320 = vrot.lane.b32.xlu1 %v2304_v8, %s2430_s10  ;;  %v4042_v6 = vsel %vm2677_vm10, 4294967295, %v4041_v6  ;;  %vm4045_vm12 = vcmp.ge.s32.totalorder %v2585_v28, 0  ;;  %vm2699_vm10 = vcmp.eq.s32.totalorder %v189_v49, 1  ;;  %vm2703_vm4 = vcmp.eq.s32.totalorder %v159_v50, 1 }
  0x19   :  { %2315 = vrot.lane.b32.xlu0 %v2304_v8, %s2431_s11  ;;  %vm2695_vm7 = vmand %vm2547_vm6, %vm4045_vm12  ;;  %v4051_v14 = vsel %vm2703_vm4, 4294967295, %v4050_v14  ;;  %vm2707_vm5 = vcmp.eq.s32.totalorder %v201_v51, 1  ;;  %v233_v16 = vrot.slane %v2666_v57, %v2566_v21  ;;  %v241_v17 = vrot.slane %v2666_v57, %v2569_v22 }
  0x1a   :  { %v4053_v15 = vsel %vm2707_vm5, 4294967295, %v4052_v15  ;;  %v229_v29 = vrot.slane %v2666_v57, %v2576_v24  ;;  %v237_v30 = vrot.slane %v2666_v57, %v2579_v25  ;;  %vm4054_vm12 = vcmp.lt.s32.totalorder %v2581_v26, 17 }
  0x1b   :  { %vm2729_vm5 = vcmp.eq.s32.totalorder %v155_v61, 1  ;;  %v4055_v34 = vmov 0  ;;  %vm4057_vm6 = vmmov %vm4054_vm12  ;;  %vm4058_vm4 = vcmp.lt.s32.totalorder %v2581_v26, 16  ;;  %vm2789_vm15 = vcmp.eq.s32.totalorder %v241_v17, 1 }
  0x1c   :  { %2330 = vrot.lane.b32.xlu1 %v2309_v7, %s2430_s10  ;;  %v4056_v34 = vsel %vm2729_vm5, 4294967295, %v4055_v34  ;;  %vm4060_vm5 = vmmov %vm4057_vm6  ;;  %v4125_v17 = vmov 0 }
  0x1d   :  { %2325 = vrot.lane.b32.xlu0 %v2309_v7, %s2431_s11  ;;  %v197_v7 = vrot.slane %v2600_v35, %v2579_v25  ;;  %v2736_v35 = vsel %vm2687_vm14, 1, %v2424_v3  ;;  %vm4061_vm14 = vmmov %vm4058_vm4 }
  0x20   :  { %337 = vrot.lane.b32.xlu1 %v2481_v0, %s2433_s12 }
  0x21   :  { %335 = vrot.lane.b32.xlu0 %v2499_v5, %s2433_s12 }
  0x24   :  { %339 = vrot.lane.b32.xlu1 %v2486_v1, %s2433_s12 }
  0x25   :  { %333 = vrot.lane.b32.xlu0 %v2491_v2, %s2433_s12 }
  0x29   :  { %375 = vperm.xlu0 %2334, %v2534_v10  }
  0x76   :  { %v2276_v47 = vpop.permute.xlu1 %2275 }
  0x77   :  { %v2266_v53 = vpop.permute.xlu0 %2265  ;;  %v2278_v58 = vunpack.i.h.bf16 %v2276_v47  ;;  %v2277_v59 = vunpack.i.l.bf16 %v2276_v47 }
  0x78   :  { %v2268_v62 = vunpack.i.h.bf16 %v2266_v53  ;;  %v2267_v63 = vunpack.i.l.bf16 %v2266_v53 }
  0x79   :  { %v43_v33 = vsel %vm4054_vm12, %v2278_v58, %v2277_v59  ;;  %vm4059_vm12 = vmmov %vm4057_vm6 }
  0x7a   :  { %v2281_v11 = vpop.permute.xlu1 %2280  ;;  %v45_v36 = vsel %vm4057_vm6, %v2267_v63, %v2268_v62  ;;  %v46_v38 = vsel %vm4059_vm12, %v2277_v59, %v2267_v63  ;;  %v44_v41 = vsel %vm4060_vm5, %v2268_v62, %v2278_v58  ;;  %vm4062_vm6 = vmmov %vm4058_vm4  ;;  %vm2774_vm12 = vcmp.eq.s32.totalorder %v197_v7, 1 }
  0x7b   :  { %v2283_v18 = vunpack.i.h.bf16 %v2281_v11  ;;  %v2282_v23 = vunpack.i.l.bf16 %v2281_v11  ;;  %v2271_v27 = vpop.permute.xlu0 %2270  ;;  %v4067_v63 = vmov 0  ;;  %vm4069_vm5 = vcmp.lt.s32.totalorder %v2581_v26, 1 }
  0x7c   :  { %v2273_v31 = vunpack.i.h.bf16 %v2271_v27  ;;  %v2272_v32 = vunpack.i.l.bf16 %v2271_v27  ;;  %v4068_v63 = vsel %vm2774_vm12, 4294967295, %v4067_v63  ;;  %v4075_v7 = vmov 0 }
  0x7d   :  { %v90_v37 = vsel %vm4058_vm4, %v2283_v18, %v2282_v23  ;;  %v4108_v11 = vmov 0 }
  0x7e   :  { %v2291_v42 = vpop.permute.xlu1 %2290  ;;  %v92_v45 = vsel %vm4061_vm14, %v2272_v32, %v2273_v31  ;;  %v2045_v46 = vpack.c.bf16 %v90_v37, %v43_v33  ;;  %v93_v47 = vsel %vm4062_vm6, %v2282_v23, %v2272_v32  ;;  %v91_v49 = vsel %vm4058_vm4, %v2273_v31, %v2283_v18  ;;  %vm4066_vm4 = vmpackc.low %vm2651_vm2, %vm2610_vm13 }
  0x7f   :  { %v2293_v50 = vunpack.i.h.bf16 %v2291_v42  ;;  %v2292_v51 = vunpack.i.l.bf16 %v2291_v42  ;;  %v2286_v52 = vpop.permute.xlu0 %2285  ;;  %v2021_v53 = vpack.c.bf16 %v92_v45, %v45_v36  ;;  %v2024_v57 = vpack.c.bf16 %v93_v47, %v46_v38  ;;  %vm4079_vm13 = vmpackc.low %vm2659_vm8, %vm2625_vm1 }
  0x80   :  { %vm4063_vm14 = vcmp.lt.s32.totalorder %v2585_v28, 16  ;;  %v2288_v59 = vunpack.i.h.bf16 %v2286_v52  ;;  %v2287_v61 = vunpack.i.l.bf16 %v2286_v52  ;;  %2047 = vmatprep.subr.msk.bf16.mxu1 %vm4066_vm4, %v2045_v46  ;;  %v2048_v62 = vpack.c.bf16 %v91_v49, %v44_v41 }
  0x81   :  { %vm2765_vm6 = vmand %vm2695_vm7, %vm4063_vm14  ;;  %v179_v8 = vsel %vm4069_vm5, %v2292_v51, %v2293_v50  ;;  %vm2785_vm14 = vcmp.eq.s32.totalorder %v233_v16, 1  ;;  %vm2793_vm4 = vcmp.eq.s32.totalorder %v229_v29, 1  ;;  %vm4077_vm5 = vcmp.lt.s32.totalorder %v2581_v26, 15 }
  0x82   :  { %vm4070_vm7 = vmpackc.low %vm2633_vm3, %vm2606_vm11  ;;  %v4076_v7 = vsel %vm2793_vm4, 4294967295, %v4075_v7  ;;  %v135_v18 = vsel %vm4077_vm5, %v2287_v61, %v2288_v59  ;;  %2050 = vmatpush1.bf16.msk.msra.mxu1 %vm4079_vm13, %v2048_v62  ;;  %v2301_v16 = vpop.permute.xlu1 %2300  ;;  %vm4080_vm2 = vnez %v4038_v60  ;;  %vm4081_vm11 = vnez %v4040_v4 }
  0x83   :  { %2023 = vmatprep.subr.msk.bf16.mxu0 %vm4070_vm7, %v2021_v53  ;;  %vm4078_vm7 = vmpackc.low %vm2655_vm9, %vm2621_vm0  ;;  %vm2813_vm4 = vcmp.eq.s32.totalorder %v237_v30, 1  ;;  %v276_v23 = vrot.slane %v2736_v35, %v2566_v21  ;;  %v2822_v27 = vsel %vm2765_vm6, 1, %v2424_v3  ;;  %v2027_v29 = vpack.c.bf16 %v179_v8, %v135_v18  ;;  %v2296_v33 = vpop.permute.xlu0 %2295 }
  0x84   :  { %2026 = vmatpush1.bf16.msk.msra.mxu0 %vm4078_vm7, %v2024_v57  ;;  %v2303_v31 = vunpack.i.h.bf16 %v2301_v16  ;;  %v2302_v32 = vunpack.i.l.bf16 %v2301_v16  ;;  %v272_v30 = vrot.slane %v2736_v35, %v2576_v24  ;;  %vm4084_vm7 = vcmp.ge.s32.totalorder %v2585_v28, 0  ;;  %vm4092_vm13 = vmpackc.low %vm4081_vm11, %vm4080_vm2 }
  0x85   :  { %vm4085_vm3 = vnez %v4016_v20  ;;  %v2298_v37 = vunpack.i.h.bf16 %v2296_v33  ;;  %v2297_v38 = vunpack.i.l.bf16 %v2296_v33  ;;  %vm4088_vm6 = vnez %v4042_v6  ;;  %2029 = vmatprep.subr.msk.bf16.mxu0 %vm4092_vm13, %v2027_v29 }
  0x86   :  { %vm2832_vm1 = vmand %vm4085_vm3, %vm4084_vm7  ;;  %v284_v41 = vrot.slane %v2736_v35, %v2569_v22  ;;  %v280_v42 = vrot.slane %v2736_v35, %v2579_v25  ;;  %vm4089_vm5 = vcmp.lt.s32.totalorder %v2581_v26, 1  ;;  %vm4093_vm8 = vnez %v4051_v14 }
  0x87   :  { %v177_v20 = vsel %vm4089_vm5, %v2303_v31, %v2302_v32  ;;  %vm4090_vm3 = vmmov %vm4089_vm5  ;;  %vm4094_vm0 = vnez %v4053_v15  ;;  %v316_v35 = vrot.slane %v2822_v27, %v2566_v21  ;;  %vm4095_vm5 = vcmp.lt.s32.totalorder %v2581_v26, 15  ;;  %v2306_v8 = vpop.permute.xlu0 %2305 }
  0x88   :  { %v178_v45 = vsel %vm4090_vm3, %v2293_v50, %v2303_v31  ;;  %vm4091_vm7 = vmmov %vm4090_vm3  ;;  %v133_v47 = vsel %vm4095_vm5, %v2298_v37, %v2297_v38  ;;  %vm2867_vm2 = vcmp.eq.s32.totalorder %v276_v23, 1  ;;  %vm4100_vm13 = vcmp.lt.s32.totalorder %v2585_v28, 16 }
  0x89   :  { %v180_v46 = vsel %vm4091_vm7, %v2302_v32, %v2292_v51  ;;  %vm4096_vm3 = vmmov %vm4095_vm5  ;;  %v2311_v51 = vpop.permute.xlu1 %2310  ;;  %v2051_v58 = vpack.c.bf16 %v177_v20, %v133_v47  ;;  %vm4103_vm5 = vnez %v4056_v34  ;;  %v2308_v18 = vunpack.i.h.bf16 %v2306_v8 }
  0x8a   :  { %v134_v49 = vsel %vm4096_vm3, %v2288_v59, %v2298_v37  ;;  %vm4097_vm7 = vmmov %vm4096_vm3  ;;  %v2313_v59 = vunpack.i.h.bf16 %v2311_v51  ;;  %v2307_v16 = vunpack.i.l.bf16 %v2306_v8  ;;  %v312_v23 = vrot.slane %v2822_v27, %v2576_v24 }
  0x8b   :  { %v136_v50 = vsel %vm4097_vm7, %v2297_v38, %v2287_v61  ;;  %vm2875_vm9 = vmand %vm2832_vm1, %vm4100_vm13  ;;  %v2054_v62 = vpack.c.bf16 %v178_v45, %v134_v49  ;;  %v2312_v61 = vunpack.i.l.bf16 %v2311_v51  ;;  %vm3968_vm7 = vmmov 1   ;;  %v2316_v47 = vpop.permute.xlu0 %2315 }
  0x8c   :  { %v2030_v57 = vpack.c.bf16 %v180_v46, %v136_v50  ;;  %vm2886_vm1 = vmpackc.low %vm2785_vm14, %vm3968_vm7  ;;  %vm2909_vm11 = vcmp.eq.s32.totalorder %v316_v35, 1  ;;  %v324_v31 = vrot.slane %v2822_v27, %v2569_v22  ;;  %v2918_v32 = vsel %vm2875_vm9, 1, %v2424_v3 }
  0x8d   :  { %vm4106_vm13 = vmpackc.low %vm2699_vm10, %vm4088_vm6  ;;  %v320_v33 = vrot.slane %v2822_v27, %v2579_v25  ;;  %v2321_v3 = vpop.permute.xlu1 %2320  ;;  %v4119_v27 = vmov 0  ;;  %v4121_v49 = vmov 0  ;;  %v2318_v51 = vunpack.i.h.bf16 %v2316_v47 }
  0x8e   :  { %2032 = vmatpush1.bf16.msk.msra.mxu0 %vm4106_vm13, %v2030_v57  ;;  %vm4107_vm3 = vmpackc.low %vm4094_vm0, %vm4093_vm8  ;;  %vm4117_vm8 = vmmov 1   ;;  %vm4118_vm0 = vnez %v4076_v7  ;;  %v2323_v7 = vunpack.i.h.bf16 %v2321_v3  ;;  %v2322_v50 = vunpack.i.l.bf16 %v2321_v3  ;;  %v572_v57 = vld [vmem:[%s3946_s2] sm:$0xff] }
  0x8f   :  { %2053 = vmatprep.subr.msk.bf16.mxu1 %vm4107_vm3, %v2051_v58  ;;  %vm2905_vm14 = vmpackc.low %vm2789_vm15, %vm3968_vm7  ;;  %vm4112_vm15 = vcmp.lt.s32.totalorder %v2581_v26, 127  ;;  %v2317_v53 = vunpack.i.l.bf16 %v2316_v47  ;;  %v4127_v58 = vmov 0 }
  0x90   :  { %v4109_v11 = vsel %vm2905_vm14, 4294967295, %v4108_v11  ;;  %v222_v12 = vsel %vm4112_vm15, %v2313_v59, %v2312_v61  ;;  %vm4113_vm3 = vmmov %vm4112_vm15 }
  0x91   :  { %v219_v36 = vsel %vm4113_vm3, %v2308_v18, %v2313_v59  ;;  %vm4114_vm13 = vmmov %vm4113_vm3  ;;  %v2057_v20 = vpack.c.bf16 %v222_v12, %v2486_v1  ;;  %v356_v12 = vrot.slane %v2918_v32, %v2566_v21  ;;  %v364_v21 = vrot.slane %v2918_v32, %v2569_v22 }
  0x92   :  { %v220_v37 = vsel %vm4114_vm13, %v2307_v16, %v2308_v18  ;;  %vm4115_vm7 = vmmov %vm4113_vm3  ;;  %v2060_v45 = vpack.c.bf16 %v219_v36, %v2481_v0  ;;  %vm2958_vm3 = vcmp.eq.s32.totalorder %v272_v30, 1  ;;  %vm4129_vm13 = vcmp.lt.s32.totalorder %v2581_v26, 112  ;;  %v2331_v30 = vpop.permute.xlu1 %2330 }
  0x93   :  { %v221_v38 = vsel %vm4115_vm7, %v2312_v61, %v2307_v16  ;;  %vm4116_vm9 = vmpackc.low %vm2774_vm12, %vm4103_vm5  ;;  %v2033_v46 = vpack.c.bf16 %v220_v37, %v2499_v5  ;;  %v2333_v61 = vunpack.i.h.bf16 %v2331_v30  ;;  %v2332_v18 = vunpack.i.l.bf16 %v2331_v30  ;;  %v2326_v16 = vpop.permute.xlu0 %2325 }
  0x94   :  { %2056 = vmatpush1.bf16.msk.msra.mxu1 %vm4116_vm9, %v2054_v62  ;;  %vm2938_vm15 = vmpackc.low %vm4118_vm0, %vm4117_vm8  ;;  %v2036_v35 = vpack.c.bf16 %v221_v38, %v2491_v2  ;;  %v303_v62 = vsel %vm4129_vm13, %v2322_v50, %v2323_v7  ;;  %vm4130_vm9 = vcmp.lt.s32.totalorder %v2581_v26, 113  ;;  %vm2986_vm13 = vcmp.eq.s32.totalorder %v324_v31, 1 }
  0x95   :  { %v4120_v27 = vsel %vm2938_vm15, 4294967295, %v4119_v27  ;;  %vm2949_vm7 = vmpackc.low %vm2813_vm4, %vm4117_vm8  ;;  %2035 = vmatprep.subr.msk.bf16.mxu0 %vm2886_vm1, %v2033_v46  ;;  %2059 = vmatprep.subr.msk.bf16.mxu1 %vm2905_vm14, %v2057_v20  ;;  %vm2962_vm8 = vcmp.eq.s32.totalorder %v284_v41, 1  ;;  %vm2966_vm4 = vcmp.eq.s32.totalorder %v280_v42, 1  ;;  %v260_v59 = vsel %vm4130_vm9, %v2317_v53, %v2318_v51 }
  0x96   :  { %v4122_v49 = vsel %vm2949_vm7, 4294967295, %v4121_v49  ;;  %v4126_v17 = vsel %vm2962_vm8, 4294967295, %v4125_v17  ;;  %v4128_v58 = vsel %vm2966_vm4, 4294967295, %v4127_v58  ;;  %2038 = vmatpush1.bf16.msk.msra.mxu0 %vm2938_vm15, %v2036_v35  ;;  %vm2982_vm14 = vcmp.eq.s32.totalorder %v312_v23, 1  ;;  %vm4140_vm5 = vmpackc.low %vm2909_vm11, %vm2867_vm2  ;;  %v338_v46 = vpop.permute.xlu1 %337 }
  0x97   :  { %v4133_v42 = vmov 0  ;;  %v2039_v8 = vpack.c.bf16 %v303_v62, %v260_v59  ;;  %v2328_v36 = vunpack.i.h.bf16 %v2326_v16  ;;  %v2327_v37 = vunpack.i.l.bf16 %v2326_v16  ;;  %vm3977_vm12 = vmpackc.low %vm2982_vm14, %vm2958_vm3 }
  0x98   :  { %2062 = vmatpush1.bf16.msk.msra.mxu1 %vm2949_vm7, %v2060_v45  ;;  %v4134_v42 = vsel %vm2986_vm13, 4294967295, %v4133_v42  ;;  %vm2992_vm9 = vcmp.eq.s32.totalorder %v320_v33, 1  ;;  %v4135_v38 = vmov 0  ;;  %v352_v23 = vrot.slane %v2918_v32, %v2576_v24 }
  0x99   :  { %v4136_v38 = vsel %vm2992_vm9, 4294967295, %v4135_v38  ;;  %vm4137_vm0 = vcmp.lt.s32.totalorder %v2581_v26, 112  ;;  %2041 = vmatprep.subr.msk.bf16.mxu0 %vm4140_vm5, %v2039_v8  ;;  %vm3978_vm5 = vmpackc.low %vm2986_vm13, %vm2962_vm8  ;;  %v360_v35 = vrot.slane %v2918_v32, %v2579_v25  ;;  %v4147_v32 = vmov 0  ;;  %v31_v8 = vld [vmem:[%s3945_s1] sm:$0xff] }
  0x9a   :  { %v302_v31 = vsel %vm4137_vm0, %v2323_v7, %v2333_v61  ;;  %vm4138_vm7 = vmmov %vm4137_vm0  ;;  %v340_v25 = vpop.permute.xlu1 %339  ;;  %v4149_v62 = vmov 0 }
  0x9b   :  { %v304_v3 = vsel %vm4138_vm7, %v2332_v18, %v2322_v50  ;;  %vm4139_vm15 = vmmov %vm4137_vm0  ;;  %vm4141_vm0 = vcmp.lt.s32.totalorder %v2581_v26, 113  ;;  %v336_v50 = vpop.permute.xlu0 %335 }
  0x9c   :  { %v305_v20 = vsel %vm4139_vm15, %v2333_v61, %v2332_v18  ;;  %v259_v24 = vsel %vm4141_vm0, %v2318_v51, %v2328_v36  ;;  %vm4142_vm7 = vmmov %vm4141_vm0  ;;  %v4144_v51 = vmov 0  ;;  %v4152_v61 = vmov 0 }
  0x9d   :  { %v261_v33 = vsel %vm4142_vm7, %v2327_v37, %v2317_v53  ;;  %vm4143_vm15 = vmmov %vm4141_vm0  ;;  %v2066_v7 = vpack.c.bf16 %v302_v31, %v259_v24  ;;  %vm3027_vm0 = vcmp.eq.s32.totalorder %v356_v12, 1  ;;  %v2435_v12 = vmov 1  }
  0x9e   :  { %v262_v45 = vsel %vm4143_vm15, %v2328_v36, %v2327_v37  ;;  %v2042_v47 = vpack.c.bf16 %v304_v3, %v261_v33  ;;  %v4145_v51 = vsel %vm3027_vm0, 4294967295, %v4144_v51  ;;  %vm3981_vm7 = vmpackc.low %vm2992_vm9, %vm2966_vm4  ;;  %vm4146_vm15 = vcmp.lt.s32.totalorder %v2581_v26, 111  ;;  %2335 = vset.pattern.permute.xlu1 %v2435_v12 }
  0x9f   :  { %v2063_v22 = vpack.c.bf16 %v305_v20, %v262_v45  ;;  %v343_v53 = vsel %vm4146_vm15, %v336_v50, %v338_v46  ;;  %vm3054_vm15 = vcmp.eq.s32.totalorder %v352_v23, 1  ;;  %v334_v30 = vpop.permute.xlu0 %333  ;;  %vm3067_vm4 = vcmp.eq.s32.totalorder %v360_v35, 1 }
  0xa0   :  { %2044 = vmatpush1.bf16.msk.msra.mxu0 %vm3977_vm12, %v2042_v47  ;;  %v4148_v32 = vsel %vm3054_vm15, 4294967295, %v4147_v32  ;;  %vm3058_vm12 = vcmp.eq.s32.totalorder %v364_v21, 1  ;;  %v4153_v61 = vsel %vm3067_vm4, 4294967295, %v4152_v61  ;;  %v2436_v36 = vmov 2  }
  0xa1   :  { %2065 = vmatprep.subr.msk.bf16.mxu1 %vm3978_vm5, %v2063_v22  ;;  %1622 = vmatprep.subr.msk.mxu0 %vm3027_vm0, %v343_v53  ;;  %v4150_v62 = vsel %vm3058_vm12, 4294967295, %v4149_v62  ;;  %vm4151_vm5 = vcmp.lt.s32.totalorder %v2581_v26, 111  ;;  %vm3985_vm0 = vcmask 588800  }
  0xa2   :  { %2068 = vmatpush1.bf16.msk.msra.mxu1 %vm3981_vm7, %v2066_v7  ;;  %v342_v59 = vsel %vm4151_vm5, %v338_v46, %v340_v25  ;;  %vm4154_vm7 = vmmov %vm4151_vm5  ;;  %2336 = vset.pattern.permute.xlu0 %v2436_v36 }
  0xa3   :  { %v344_v18 = vsel %vm4154_vm7, %v334_v30, %v336_v50  ;;  %vm4155_vm9 = vmmov %vm4151_vm5  ;;  %vm4156_vm5 = vcmp.lt.s32.totalorder %v2581_v26, 17  ;;  %vm4157_vm7 = vcmp.lt.s32.totalorder %v2581_v26, 16 }
  0xa4   :  { %v345_v16 = vsel %vm4155_vm9, %v340_v25, %v334_v30  ;;  %1623 = vmatpush1.msk.msra.mxu0 %vm3054_vm15, %v344_v18  ;;  %vm894_vm9 = vcmask 1043456   ;;  %vm4163_vm15 = vcmp.lt.s32.totalorder %v2581_v26, 16 }
  0xa5   :  { %1639 = vmatprep.subr.msk.mxu1 %vm3058_vm12, %v345_v16  ;;  %1624 = vmatmul.mubr.msk.f32.vlgmr.msra.gmra.mrb[0].mxu0 %vm3985_vm0, %v31_v8  ;;  %vm4161_vm12 = vmmov %vm4156_vm5 }
  0xa6   :  { %1640 = vmatpush1.msk.msra.mxu1 %vm3067_vm4, %v342_v59  ;;  %772 = vmatprep.mubr.f32.mxu0 %v2432_v9  ;;  %vm4164_vm8 = vmmov %vm4163_vm15 }
  0xa7   :  { %1641 = vmatmul.mubr.msk.f32.vlgmr.msra.gmra.mrb[0].mxu1 %vm3985_vm0, %v31_v8  ;;  %vm4159_vm0 = vnez %v4018_v39 }
  0xa8   :  { %843 = vmatprep.mubr.f32.mxu1 %v2432_v9  ;;  %v376_v37 = vpop.permute.xlu0 %375 }
 0x178   :  { %v448_v23 = vpop.f32.mrb[0].mxu0 }
 0x179   :  { %v449_v31 = vadd.f32 %v448_v23, %v376_v37  ;;  %v450_v3 = vpop.f32.mrb[1].mxu0 }
 0x17a   :  { %v519_v20 = vpop.f32.mrb[0].mxu1  ;;  %v451_v21 = vadd.f32 %v450_v3, %v376_v37 }
 0x17b   :  { %v520_v24 = vadd.f32 %v519_v20, %v376_v37  ;;  %v521_v33 = vpop.f32.mrb[1].mxu1  ;;  %v529_v45 = vmul.f32 %v449_v31, %v449_v31 }
 0x17c   :  { %v524_v46 = vadd.f32 %v451_v21, %v449_v31  ;;  %v530_v35 = vmul.f32 %v451_v21, %v451_v21  ;;  %v522_v47 = vadd.f32 %v521_v33, %v376_v37 }
 0x17d   :  { %v531_v22 = vmul.f32 %v520_v24, %v520_v24 }
 0x17e   :  { %v525_v7 = vadd.f32 %v524_v46, %v520_v24  ;;  %v533_v50 = vadd.f32 %v530_v35, %v529_v45  ;;  %v532_v53 = vmul.f32 %v522_v47, %v522_v47 }
 0x180   :  { %v526_v9 = vadd.f32 %v525_v7, %v522_v47  ;;  %v534_v25 = vadd.f32 %v533_v50, %v531_v22 }
 0x182   :  { %527 = vadd.xlane.f32.xlu1 %v526_v9  ;;  %v535_v59 = vadd.f32 %v534_v25, %v532_v53 }
 0x184   :  { %536 = vadd.xlane.f32.xlu0 %v535_v59 }
 0x193   :  { %553 = vperm.xlu1 %2335, %v2534_v10  }
 0x19a   :  { %561 = vperm.xlu0 %2336, %v2534_v10  }
 0x20f   :  { %v528_v30 = vpop.xlane.xlu1 %527 }
 0x210   :  { %v538_v8 = vmul.f32 0.001953125, %v528_v30 }
 0x211   :  { %v537_v18 = vpop.xlane.xlu0 %536 }
 0x212   :  { %v539_v16 = vmul.f32 0.001953125, %v537_v18  ;;  %v540_v12 = vmul.f32 %v538_v8, %v538_v8  ;;  %v542_v23 = vsub.f32 %v449_v31, %v538_v8  ;;  %v543_v3 = vsub.f32 %v451_v21, %v538_v8 }
 0x213   :  { %v544_v20 = vsub.f32 %v520_v24, %v538_v8  ;;  %v545_v33 = vsub.f32 %v522_v47, %v538_v8  ;;  %v554_v46 = vpop.permute.xlu1 %553 }
 0x214   :  { %v541_v36 = vsub.f32 %v539_v16, %v540_v12 }
 0x216   :  { %v546_v37 = vadd.f32 1e-05, %v541_v36 }
 0x218   :  { %2413 = vrsqrt.f32 %v546_v37 }
 0x219   :  { %v562_v9 = vpop.permute.xlu0 %561 }
 0x222   :  { %v2414_v45 = vpop.eup %2413 }
 0x223   :  { %v548_v35 = vmul.f32 %v2414_v45, %v542_v23  ;;  %v549_v22 = vmul.f32 %v2414_v45, %v543_v3  ;;  %v550_v7 = vmul.f32 %v2414_v45, %v544_v20  ;;  %v551_v50 = vmul.f32 %v2414_v45, %v545_v33 }
 0x224   :  { %v2437_v23 = vmov 3   ;;  %v2438_v3 = vmov 4   ;;  %v2439_v20 = vmov 5   ;;  %v895_v33 = vsel %vm894_vm9, %v2491_v2, 0.0 }
 0x225   :  { %v556_v53 = vmul.f32 %v554_v46, %v548_v35  ;;  %v557_v25 = vmul.f32 %v554_v46, %v549_v22  ;;  %v558_v59 = vmul.f32 %v554_v46, %v550_v7  ;;  %v559_v30 = vmul.f32 %v554_v46, %v551_v50  ;;  %2407 = vset.pattern.permute.xlu0 %v2437_v23 }
 0x226   :  { %2408 = vset.pattern.permute.xlu1 %v2438_v3  ;;  %v896_v45 = vsel %vm894_vm9, %v2499_v5, 0.0  ;;  %v904_v46 = vmul.f32 %v2491_v2, %v2491_v2  ;;  %v905_v35 = vmul.f32 %v2499_v5, %v2499_v5  ;;  %v898_v7 = vsel %vm894_vm9, %v2481_v0, 0.0 }
 0x227   :  { %v564_v18 = vadd.f32 %v562_v9, %v556_v53  ;;  %v565_v19 = vadd.f32 %v562_v9, %v557_v25  ;;  %v566_v16 = vadd.f32 %v562_v9, %v558_v59  ;;  %v567_v24 = vadd.f32 %v562_v9, %v559_v30 }
 0x228   :  { %v897_v22 = vadd.f32 %v896_v45, %v895_v33  ;;  %v906_v50 = vmul.f32 %v2481_v0, %v2481_v0  ;;  %v908_v9 = vsel %vm894_vm9, %v904_v46, 0.0  ;;  %v909_v53 = vsel %vm894_vm9, %v905_v35, 0.0 }
 0x229   :  { %v3087_v12 = vmax.f32 %v564_v18, 0.0  ;;  %v3089_v31 = vmax.f32 %v565_v19, 0.0  ;;  %v3091_v21 = vmax.f32 %v566_v16, 0.0  ;;  %v3099_v36 = vmax.f32 %v567_v24, 0.0 }
 0x22a   :  { %v899_v25 = vadd.f32 %v898_v7, %v897_v22  ;;  %v910_v59 = vadd.f32 %v909_v53, %v908_v9  ;;  %v900_v2 = vsel %vm894_vm9, %v2486_v1, 0.0  ;;  %v907_v5 = vmul.f32 %v2486_v1, %v2486_v1 }
 0x22b   :  { %v2377_v47 = vpack.i.bf16 %v3091_v21, %v3089_v31  ;;  %v2337_v8 = vpack.i.bf16 %v3089_v31, %v3087_v12  ;;  %v2397_v19 = vpack.i.bf16 %v3099_v36, %v3087_v12  ;;  %v2347_v37 = vpack.i.bf16 %v3091_v21, %v3099_v36 }
 0x22c   :  { %v911_v30 = vsel %vm894_vm9, %v906_v50, 0.0  ;;  %v901_v18 = vadd.f32 %v900_v2, %v899_v25  ;;  %v913_v24 = vsel %vm894_vm9, %v907_v5, 0.0  ;;  %vm4158_vm9 = vnez %v4028_v48 }
 0x22d   :  { %2378 = vrot.lane.b32.xlu0 %v2377_v47, %s2429_s9  ;;  %2338 = vrot.lane.b32.xlu1 %v2337_v8, %s2425_s29  ;;  %v912_v16 = vadd.f32 %v911_v30, %v910_v59  ;;  %vm4160_vm4 = vmpackc.low %vm4158_vm9, %vm4159_vm0  ;;  %vm4167_vm0 = vnez %v4024_v43 }
 0x22f   :  { %v914_v0 = vadd.f32 %v913_v24, %v912_v16 }
 0x231   :  { %2388 = vrot.lane.b32.xlu0 %v2377_v47, %s2431_s11  ;;  %2343 = vrot.lane.b32.xlu1 %v2337_v8, %s2426_s30 }
 0x235   :  { %2398 = vrot.lane.b32.xlu0 %v2397_v19, %s2431_s11  ;;  %2348 = vrot.lane.b32.xlu1 %v2347_v37, %s2425_s29 }
 0x239   :  { %687 = vrot.lane.b32.xlu0 %v3089_v31, %s2433_s12  ;;  %2353 = vrot.lane.b32.xlu1 %v2347_v37, %s2426_s30 }
 0x23d   :  { %685 = vrot.lane.b32.xlu0 %v3087_v12, %s2433_s12  ;;  %2358 = vrot.lane.b32.xlu1 %v2337_v8, %s2428_s8 }
 0x241   :  { %2363 = vrot.lane.b32.xlu1 %v2337_v8, %s2427_s7  ;;  %702 = vperm.xlu0 %2407, %v2534_v10  }
 0x245   :  { %2368 = vrot.lane.b32.xlu1 %v2347_v37, %s2428_s8 }
 0x249   :  { %2373 = vrot.lane.b32.xlu1 %v2347_v37, %s2427_s7 }
 0x24d   :  { %2383 = vrot.lane.b32.xlu1 %v2397_v19, %s2429_s9 }
 0x251   :  { %2393 = vrot.lane.b32.xlu1 %v2377_v47, %s2430_s10 }
 0x255   :  { %2403 = vrot.lane.b32.xlu1 %v2397_v19, %s2430_s10 }
 0x259   :  { %689 = vrot.lane.b32.xlu1 %v3091_v21, %s2433_s12 }
 0x25d   :  { %691 = vrot.lane.b32.xlu1 %v3099_v36, %s2433_s12 }
 0x260   :  { %902 = vadd.xlane.f32.xlu0 %v901_v18 }
 0x261   :  { %879 = vperm.xlu1 %2408, %v2534_v10  }
 0x264   :  { %915 = vadd.xlane.f32.xlu0 %v914_v0 }
 0x265   :  { %2410 = vset.pattern.permute.xlu1 %v2439_v20 }
 0x266   :  { %887 = vperm.xlu1 %2410, %v2534_v10  }
 0x29f   :  { %v2339_v47 = vpop.permute.xlu1 %2338  ;;  %v2379_v43 = vpop.permute.xlu0 %2378 }
 0x2a0   :  { %v2341_v8 = vunpack.i.h.bf16 %v2339_v47  ;;  %v2340_v19 = vunpack.i.l.bf16 %v2339_v47 }
 0x2a2   :  { %v583_v20 = vsel %vm4156_vm5, %v2340_v19, %v2341_v8 }
 0x2a3   :  { %v2344_v37 = vpop.permute.xlu1 %2343 }
 0x2a4   :  { %v2346_v23 = vunpack.i.h.bf16 %v2344_v37  ;;  %v2345_v3 = vunpack.i.l.bf16 %v2344_v37  ;;  %v2381_v37 = vunpack.i.h.bf16 %v2379_v43 }
 0x2a6   :  { %v599_v1 = vsel %vm4157_vm7, %v2345_v3, %v2346_v23  ;;  %vm4162_vm7 = vmmov %vm4156_vm5 }
 0x2a7   :  { %v2069_v33 = vpack.c.bf16 %v599_v1, %v583_v20  ;;  %v2349_v45 = vpop.permute.xlu1 %2348 }
 0x2a8   :  { %v2351_v46 = vunpack.i.h.bf16 %v2349_v45  ;;  %v2350_v35 = vunpack.i.l.bf16 %v2349_v45 }
 0x2a9   :  { %2071 = vmatprep.subr.msk.bf16.mxu0 %vm4160_vm4, %v2069_v33  ;;  %vm4165_vm4 = vmmov %vm4164_vm8 }
 0x2aa   :  { %v581_v9 = vsel %vm4161_vm12, %v2351_v46, %v2350_v35  ;;  %v582_v53 = vsel %vm4156_vm5, %v2341_v8, %v2351_v46  ;;  %v584_v25 = vsel %vm4162_vm7, %v2350_v35, %v2340_v19  ;;  %vm4166_vm12 = vnez %v4034_v55 }
 0x2ab   :  { %v2354_v22 = vpop.permute.xlu1 %2353  ;;  %vm4168_vm9 = vmpackc.low %vm4166_vm12, %vm4167_vm0  ;;  %vm4169_vm5 = vnez %v4032_v54  ;;  %vm4175_vm12 = vcmp.lt.s32.totalorder %v2581_v26, 15  ;;  %vm4176_vm0 = vcmp.lt.s32.totalorder %v2581_v26, 1 }
 0x2ac   :  { %v2356_v7 = vunpack.i.h.bf16 %v2354_v22  ;;  %v2355_v50 = vunpack.i.l.bf16 %v2354_v22 }
 0x2ae   :  { %v597_v59 = vsel %vm4163_vm15, %v2356_v7, %v2355_v50  ;;  %v598_v39 = vsel %vm4164_vm8, %v2346_v23, %v2356_v7  ;;  %v600_v48 = vsel %vm4165_vm4, %v2355_v50, %v2345_v3  ;;  %vm4170_vm15 = vnez %v4020_v40 }
 0x2af   :  { %v2072_v2 = vpack.c.bf16 %v600_v48, %v584_v25  ;;  %v2093_v5 = vpack.c.bf16 %v597_v59, %v581_v9  ;;  %v2096_v30 = vpack.c.bf16 %v598_v39, %v582_v53  ;;  %v2359_v18 = vpop.permute.xlu1 %2358  ;;  %vm4171_vm7 = vmpackc.low %vm4169_vm5, %vm4170_vm15  ;;  %vm4172_vm8 = vnez %v4036_v56 }
 0x2b0   :  { %v2361_v16 = vunpack.i.h.bf16 %v2359_v18  ;;  %v2360_v24 = vunpack.i.l.bf16 %v2359_v18  ;;  %vm4173_vm4 = vnez %v4026_v44  ;;  %v2380_v23 = vunpack.i.l.bf16 %v2379_v43  ;;  %v2389_v44 = vpop.permute.xlu0 %2388 }
 0x2b1   :  { %2074 = vmatpush1.bf16.msk.msra.mxu0 %vm4168_vm9, %v2072_v2  ;;  %2095 = vmatprep.subr.msk.bf16.mxu1 %vm4171_vm7, %v2093_v5  ;;  %vm4174_vm13 = vmpackc.low %vm4172_vm8, %vm4173_vm4  ;;  %vm4177_vm9 = vnez %v4040_v4  ;;  %vm4180_vm15 = vcmp.lt.s32.totalorder %v2581_v26, 127  ;;  %v2391_v2 = vunpack.i.h.bf16 %v2389_v44 }
 0x2b2   :  { %2098 = vmatpush1.bf16.msk.msra.mxu1 %vm4174_vm13, %v2096_v30  ;;  %v615_v8 = vsel %vm4175_vm12, %v2360_v24, %v2361_v16  ;;  %vm4178_vm13 = vnez %v4038_v60  ;;  %v646_v45 = vsel %vm4180_vm15, %v2380_v23, %v2381_v37  ;;  %vm4181_vm7 = vmmov %vm4175_vm12  ;;  %vm4188_vm15 = vnez %v4051_v14 }
 0x2b3   :  { %v2364_v0 = vpop.permute.xlu1 %2363  ;;  %vm4179_vm5 = vmpackc.low %vm4177_vm9, %vm4178_vm13  ;;  %v2081_v59 = vpack.c.bf16 %v646_v45, %v3089_v31  ;;  %v2390_v30 = vunpack.i.l.bf16 %v2389_v44 }
 0x2b4   :  { %v2366_v55 = vunpack.i.h.bf16 %v2364_v0  ;;  %v2365_v47 = vunpack.i.l.bf16 %v2364_v0  ;;  %vm4182_vm8 = vmmov %vm4181_vm7  ;;  %v2399_v5 = vpop.permute.xlu0 %2398 }
 0x2b5   :  { %vm4183_vm4 = vmmov %vm4181_vm7 }
 0x2b6   :  { %v631_v40 = vsel %vm4176_vm0, %v2365_v47, %v2366_v55  ;;  %vm4184_vm12 = vmmov %vm4176_vm0 }
 0x2b7   :  { %v2075_v54 = vpack.c.bf16 %v631_v40, %v615_v8  ;;  %v2369_v19 = vpop.permute.xlu1 %2368  ;;  %vm4185_vm9 = vmmov %vm4176_vm0 }
 0x2b8   :  { %v2371_v3 = vunpack.i.h.bf16 %v2369_v19  ;;  %v2370_v56 = vunpack.i.l.bf16 %v2369_v19  ;;  %vm4186_vm13 = vmpackc.low %vm2699_vm10, %vm4088_vm6  ;;  %vm4193_vm10 = vnez %v4068_v63  ;;  %vm4194_vm6 = vnez %v4056_v34  ;;  %v688_v28 = vpop.permute.xlu0 %687 }
 0x2b9   :  { %2077 = vmatprep.subr.msk.bf16.mxu0 %vm4179_vm5, %v2075_v54  ;;  %vm4187_vm5 = vnez %v4053_v15 }
 0x2ba   :  { %v613_v46 = vsel %vm4181_vm7, %v2371_v3, %v2370_v56  ;;  %v614_v35 = vsel %vm4182_vm8, %v2361_v16, %v2371_v3  ;;  %v616_v4 = vsel %vm4183_vm4, %v2370_v56, %v2360_v24  ;;  %vm4189_vm7 = vmpackc.low %vm4187_vm5, %vm4188_vm15  ;;  %vm4190_vm8 = vcmp.lt.s32.totalorder %v2581_v26, 127 }
 0x2bb   :  { %v2374_v20 = vpop.permute.xlu1 %2373  ;;  %vm4191_vm4 = vmmov %vm4190_vm8  ;;  %vm4199_vm5 = vcmp.lt.s32.totalorder %v2581_v26, 112  ;;  %vm4200_vm15 = vnez %v4122_v49 }
 0x2bc   :  { %v2376_v1 = vunpack.i.h.bf16 %v2374_v20  ;;  %v2375_v33 = vunpack.i.l.bf16 %v2374_v20  ;;  %v686_v3 = vpop.permute.xlu0 %685 }
 0x2be   :  { %v629_v60 = vsel %vm4184_vm12, %v2376_v1, %v2375_v33  ;;  %v630_v22 = vsel %vm4176_vm0, %v2366_v55, %v2376_v1  ;;  %v632_v7 = vsel %vm4185_vm9, %v2375_v33, %v2365_v47  ;;  %vm4192_vm12 = vmmov %vm4191_vm4  ;;  %v2401_v55 = vunpack.i.h.bf16 %v2399_v5 }
 0x2bf   :  { %v2078_v50 = vpack.c.bf16 %v632_v7, %v616_v4  ;;  %v2099_v9 = vpack.c.bf16 %v629_v60, %v613_v46  ;;  %v2102_v53 = vpack.c.bf16 %v630_v22, %v614_v35  ;;  %v2384_v25 = vpop.permute.xlu1 %2383  ;;  %vm4195_vm0 = vmpackc.low %vm4193_vm10, %vm4194_vm6  ;;  %v2400_v47 = vunpack.i.l.bf16 %v2399_v5 }
 0x2c0   :  { %v2386_v39 = vunpack.i.h.bf16 %v2384_v25  ;;  %v2385_v48 = vunpack.i.l.bf16 %v2384_v25  ;;  %vm4196_vm9 = vnez %v4120_v27  ;;  %vm4205_vm10 = vmmov %vm4199_vm5  ;;  %v703_v56 = vpop.permute.xlu0 %702  ;;  %v2419_v25 = vld [vmem:[%s3943_s3] sm:$0xff] }
 0x2c1   :  { %2080 = vmatpush1.bf16.msk.msra.mxu0 %vm4186_vm13, %v2078_v50  ;;  %2101 = vmatprep.subr.msk.bf16.mxu1 %vm4189_vm7, %v2099_v9  ;;  %vm4198_vm13 = vcmp.lt.s32.totalorder %v2581_v26, 113  ;;  %vm4206_vm6 = vmmov %vm4199_vm5 }
 0x2c2   :  { %v645_v31 = vsel %vm4190_vm8, %v2381_v37, %v2386_v39  ;;  %v647_v18 = vsel %vm4191_vm4, %v2385_v48, %v2380_v23  ;;  %v648_v13 = vsel %vm4192_vm12, %v2386_v39, %v2385_v48  ;;  %2083 = vmatprep.subr.msk.bf16.mxu0 %vm2886_vm1, %v2081_v59  ;;  %2104 = vmatpush1.bf16.msk.msra.mxu1 %vm4195_vm0, %v2102_v53  ;;  %vm4201_vm7 = vmmov %vm4198_vm13 }
 0x2c3   :  { %v2108_v6 = vpack.c.bf16 %v645_v31, %v3091_v21  ;;  %v2084_v14 = vpack.c.bf16 %v647_v18, %v3087_v12  ;;  %v2105_v15 = vpack.c.bf16 %v648_v13, %v3099_v36  ;;  %v2394_v16 = vpop.permute.xlu1 %2393  ;;  %vm4197_vm1 = vnez %v4109_v11  ;;  %vm4202_vm8 = vmmov %vm4201_vm7 }
 0x2c4   :  { %v2396_v24 = vunpack.i.h.bf16 %v2394_v16  ;;  %v2395_v0 = vunpack.i.l.bf16 %v2394_v16  ;;  %v662_v34 = vsel %vm4198_vm13, %v2390_v30, %v2391_v2  ;;  %v661_v27 = vsel %vm4201_vm7, %v2391_v2, %v2401_v55  ;;  %vm4203_vm4 = vmpackc.low %vm2909_vm11, %vm2867_vm2 }
 0x2c5   :  { %2086 = vmatpush1.bf16.msk.msra.mxu0 %vm4196_vm9, %v2084_v14  ;;  %2107 = vmatprep.subr.msk.bf16.mxu1 %vm4197_vm1, %v2105_v15  ;;  %v663_v11 = vsel %vm4202_vm8, %v2400_v47, %v2390_v30  ;;  %vm4204_vm12 = vmmov %vm4201_vm7  ;;  %vm4208_vm9 = vcmp.lt.s32.totalorder %v2581_v26, 111  ;;  %vm4210_vm2 = vnez %v4134_v42  ;;  %vm4211_vm1 = vnez %v4126_v17  ;;  %v2421_v15 = vld [vmem:[%s3942_s0 + $0x18] sm:$0xff] }
 0x2c6   :  { %v678_v63 = vsel %vm4199_vm5, %v2395_v0, %v2396_v24  ;;  %2110 = vmatpush1.bf16.msk.msra.mxu1 %vm4200_vm15, %v2108_v6  ;;  %v664_v49 = vsel %vm4204_vm12, %v2401_v55, %v2400_v47  ;;  %vm4207_vm0 = vmmov %vm4199_vm5  ;;  %vm4213_vm5 = vnez %v4145_v51  ;;  %vm4214_vm15 = vnez %v4136_v38  ;;  %v2420_v6 = vld [vmem:[%s3942_s0 + $0x8] sm:$0xff] }
 0x2c7   :  { %v2087_v12 = vpack.c.bf16 %v678_v63, %v662_v34  ;;  %v2404_v21 = vpop.permute.xlu1 %2403  ;;  %vm4209_vm11 = vmpackc.low %vm2982_vm14, %vm2958_vm3  ;;  %vm4215_vm7 = vnez %v4128_v58  ;;  %vm4220_vm12 = vnez %v4148_v32  ;;  %v2440_v58 = vmov 6   ;;  %v2423_v34 = vld [vmem:[%s3942_s0] sm:$0xff] }
 0x2c8   :  { %v2406_v36 = vunpack.i.h.bf16 %v2404_v21  ;;  %v2405_v43 = vunpack.i.l.bf16 %v2404_v21  ;;  %vm4212_vm13 = vmpackc.low %vm4210_vm2, %vm4211_vm1  ;;  %2409 = vset.pattern.permute.xlu0 %v2440_v58  ;;  %v2441_v38 = vmov 7  }
 0x2c9   :  { %2089 = vmatprep.subr.msk.bf16.mxu0 %vm4203_vm4, %v2087_v12  ;;  %vm4216_vm8 = vmpackc.low %vm4214_vm15, %vm4215_vm7  ;;  %2411 = vset.pattern.permute.xlu1 %v2441_v38 }
 0x2ca   :  { %v677_v8 = vsel %vm4205_vm10, %v2396_v24, %v2406_v36  ;;  %v679_v40 = vsel %vm4206_vm6, %v2405_v43, %v2395_v0  ;;  %v680_v54 = vsel %vm4207_vm0, %v2406_v36, %v2405_v43  ;;  %vm4217_vm14 = vmmov %vm4208_vm9  ;;  %vm4221_vm10 = vnez %v4150_v62  ;;  %932 = vperm.xlu0 %2409, %v2534_v10   ;;  %v2422_v0 = vld [vmem:[%s3942_s0 + $0x10] sm:$0xff] }
 0x2cb   :  { %v2090_v19 = vpack.c.bf16 %v679_v40, %v663_v11  ;;  %v2111_v37 = vpack.c.bf16 %v680_v54, %v664_v49  ;;  %v2114_v23 = vpack.c.bf16 %v677_v8, %v661_v27  ;;  %v690_v29 = vpop.permute.xlu1 %689  ;;  %v695_v42 = vsel %vm4217_vm14, %v686_v3, %v688_v28  ;;  %vm4218_vm3 = vmmov %vm4208_vm9 }
 0x2cc   :  { %v694_v52 = vsel %vm4208_vm9, %v688_v28, %v690_v29  ;;  %vm4219_vm4 = vmmov %vm4218_vm3  ;;  %vm4222_vm6 = vcmask 588800   ;;  %vm4223_vm0 = vnez %v4153_v61 }
 0x2cd   :  { %2092 = vmatpush1.bf16.msk.msra.mxu0 %vm4209_vm11, %v2090_v19  ;;  %2113 = vmatprep.subr.msk.bf16.mxu1 %vm4212_vm13, %v2111_v37  ;;  %vm4224_vm9 = vmmov %vm4222_vm6 }
 0x2ce   :  { %1656 = vmatprep.subr.msk.mxu0 %vm4213_vm5, %v694_v52  ;;  %2116 = vmatpush1.bf16.msk.msra.mxu1 %vm4216_vm8, %v2114_v23 }
 0x2cf   :  { %v692_v41 = vpop.permute.xlu1 %691  ;;  %2412 = vset.pattern.permute.xlu0 %v2441_v38 }
 0x2d0   :  { %v693_v17 = vsel %vm4218_vm3, %v690_v29, %v692_v41  ;;  %v696_v51 = vsel %vm4219_vm4, %v692_v41, %v686_v3 }
 0x2d1   :  { %1657 = vmatpush1.msk.msra.mxu0 %vm4220_vm12, %v695_v42  ;;  %1673 = vmatprep.subr.msk.mxu1 %vm4221_vm10, %v696_v51 }
 0x2d2   :  { %1658 = vmatmul.mubr.msk.f32.vlgmr.msra.gmra.mrb[2].mxu0 %vm4222_vm6, %v572_v57  ;;  %1674 = vmatpush1.msk.msra.mxu1 %vm4223_vm0, %v693_v17 }
 0x2d3   :  { %1675 = vmatmul.mubr.msk.f32.vlgmr.msra.gmra.mrb[2].mxu1 %vm4224_vm9, %v572_v57 }
 0x2e0   :  { %v880_v18 = vpop.permute.xlu1 %879 }
 0x2e5   :  { %v888_v13 = vpop.permute.xlu1 %887 }
 0x2ed   :  { %v903_v59 = vpop.xlane.xlu0 %902 }
 0x2ee   :  { %v917_v39 = vmul.f32 0.001953125, %v903_v59 }
 0x2f0   :  { %v919_v2 = vmul.f32 %v917_v39, %v917_v39  ;;  %v922_v14 = vsub.f32 %v2420_v6, %v917_v39  ;;  %v924_v16 = vsub.f32 %v2421_v15, %v917_v39  ;;  %v923_v55 = vsub.f32 %v2422_v0, %v917_v39 }
 0x2f1   :  { %v916_v48 = vpop.xlane.xlu0 %915  ;;  %v921_v63 = vsub.f32 %v2423_v34, %v917_v39  ;;  %v4225_v39 = vld [vmem:[#allocation2_spill] sm:$0xff] }
 0x2f2   :  { %v918_v5 = vmul.f32 0.001953125, %v916_v48  ;;  %v1036_v48 = vadd.s32 128, %v4225_v39  ;;  %v1038_v6 = vadd.s32 144, %v4225_v39  ;;  %v1023_v0 = vadd.s32 24, %v4225_v39 }
 0x2f3   :  { %v1052_v34 = vadd.s32 256, %v4225_v39 }
 0x2f4   :  { %v920_v30 = vsub.f32 %v918_v5, %v919_v2  ;;  %v1037_v2 = vadd.s32 136, %v4225_v39  ;;  %v1021_v5 = vadd.s32 8, %v4225_v39 }
 0x2f6   :  { %v925_v31 = vadd.f32 1e-05, %v920_v30  ;;  %v3391_v30 = vld [vmem:[%s3947_s5] ss:$0 sm:$0xff] }
 0x2f7   :  { %vm1105_vm11 = vcmp.eq.s32.totalorder %v1036_v48, %v3391_v30  ;;  %vm1106_vm2 = vcmp.eq.s32.totalorder %v1037_v2, %v3391_v30  ;;  %vm1089_vm1 = vcmp.eq.s32.totalorder %v4225_v39, %v3391_v30  ;;  %vm1090_vm13 = vcmp.eq.s32.totalorder %v1021_v5, %v3391_v30 }
 0x2f8   :  { %2415 = vrsqrt.f32 %v925_v31  ;;  %vm3398_vm5 = vmpackc.low %vm1106_vm2, %vm1105_vm11  ;;  %vm1107_vm7 = vcmp.eq.s32.totalorder %v1038_v6, %v3391_v30  ;;  %vm1092_vm4 = vcmp.eq.s32.totalorder %v1023_v0, %v3391_v30  ;;  %vm1121_vm0 = vcmp.eq.s32.totalorder %v1052_v34, %v3391_v30 }
 0x2f9   :  { %vm3405_vm15 = vmpackc.low %vm1090_vm13, %vm1089_vm1  ;;  %vm4236_vm2 = vcmp.lt.s32.totalorder %v2581_v26, 127  ;;  %v1045_v48 = vadd.s32 200, %v4225_v39  ;;  %v1028_v2 = vadd.s32 64, %v4225_v39  ;;  %v1029_v5 = vadd.s32 72, %v4225_v39 }
 0x2fa   :  { %vm4237_vm1 = vmmov %vm4236_vm2  ;;  %v4254_v6 = vmov 0  ;;  %v1058_v0 = vadd.s32 304, %v4225_v39  ;;  %v4260_v34 = vmov 0 }
 0x2fb   :  { %vm4238_vm13 = vmmov %vm4237_vm1 }
 0x302   :  { %v2416_v24 = vpop.eup %2415 }
 0x303   :  { %v928_v12 = vmul.f32 %v2416_v24, %v922_v14  ;;  %v930_v21 = vmul.f32 %v2416_v24, %v924_v16  ;;  %v929_v36 = vmul.f32 %v2416_v24, %v923_v55  ;;  %v927_v11 = vmul.f32 %v2416_v24, %v921_v63 }
 0x304   :  { %v1039_v14 = vadd.s32 152, %v4225_v39  ;;  %v1022_v24 = vadd.s32 16, %v4225_v39  ;;  %v1068_v55 = vadd.s32 384, %v4225_v39  ;;  %v1053_v63 = vadd.s32 264, %v4225_v39 }
 0x306   :  { %vm1108_vm8 = vcmp.eq.s32.totalorder %v1039_v14, %v3391_v30  ;;  %vm1091_vm3 = vcmp.eq.s32.totalorder %v1022_v24, %v3391_v30  ;;  %vm1137_vm12 = vcmp.eq.s32.totalorder %v1068_v55, %v3391_v30  ;;  %vm1122_vm9 = vcmp.eq.s32.totalorder %v1053_v63, %v3391_v30 }
 0x307   :  { %vm3422_vm14 = vmpackc.low %vm1108_vm8, %vm1107_vm7  ;;  %v1074_v14 = vadd.s32 432, %v4225_v39  ;;  %v4258_v24 = vmov 0  ;;  %v1059_v55 = vadd.s32 312, %v4225_v39  ;;  %v1046_v63 = vadd.s32 208, %v4225_v39 }
 0x308   :  { %vm3433_vm6 = vmpackc.low %vm1092_vm4, %vm1091_vm3 }
 0x309   :  { %vm4239_vm7 = vmmov %vm4237_vm1 }
 0x30a   :  { %vm3467_vm8 = vmpackc.low %vm1122_vm9, %vm1121_vm0 }
 0x349   :  { %v933_v43 = vpop.permute.xlu0 %932 }
 0x34a   :  { %v936_v40 = vmul.f32 %v933_v43, %v928_v12  ;;  %v938_v54 = vmul.f32 %v933_v43, %v930_v21  ;;  %v937_v37 = vmul.f32 %v933_v43, %v929_v36  ;;  %v935_v29 = vmul.f32 %v933_v43, %v927_v11 }
 0x34b   :  { %v1040_v21 = vadd.s32 160, %v4225_v39  ;;  %v1041_v36 = vadd.s32 168, %v4225_v39 }
 0x34d   :  { %vm1109_vm3 = vcmp.eq.s32.totalorder %v1040_v21, %v3391_v30  ;;  %vm1110_vm4 = vcmp.eq.s32.totalorder %v1041_v36, %v3391_v30  ;;  %v1047_v21 = vadd.s32 216, %v4225_v39  ;;  %v1030_v36 = vadd.s32 80, %v4225_v39 }
 0x34e   :  { %vm3496_vm0 = vmpackc.low %vm1110_vm4, %vm1109_vm3 }
 0x3a5   :  { %v774_v32 = vpop.f32.mrb[2].mxu0 }
 0x3a6   :  { %v3298_v44 = vadd.f32 %v774_v32, %v703_v56  ;;  %v776_v62 = vpop.f32.mrb[3].mxu0  ;;  %v845_v20 = vpop.f32.mrb[2].mxu1 }
 0x3a7   :  { %v3300_v1 = vadd.f32 %v776_v62, %v703_v56  ;;  %v3302_v33 = vadd.f32 %v845_v20, %v703_v56  ;;  %v847_v61 = vpop.f32.mrb[3].mxu1 }
 0x3a8   :  { %v855_v45 = vmul.f32 %v3298_v44, %v3298_v44  ;;  %v3312_v4 = vadd.f32 %v847_v61, %v703_v56 }
 0x3a9   :  { %v850_v46 = vadd.f32 %v3300_v1, %v3298_v44  ;;  %v856_v10 = vmul.f32 %v3300_v1, %v3300_v1  ;;  %v857_v35 = vmul.f32 %v3302_v33, %v3302_v33 }
 0x3aa   :  { %v858_v9 = vmul.f32 %v3312_v4, %v3312_v4 }
 0x3ab   :  { %v851_v60 = vadd.f32 %v850_v46, %v3302_v33  ;;  %v859_v22 = vadd.f32 %v856_v10, %v855_v45 }
 0x3ad   :  { %v852_v7 = vadd.f32 %v851_v60, %v3312_v4  ;;  %v860_v50 = vadd.f32 %v859_v22, %v857_v35 }
 0x3af   :  { %853 = vadd.xlane.f32.xlu1 %v852_v7  ;;  %v861_v53 = vadd.f32 %v860_v50, %v858_v9 }
 0x3b3   :  { %862 = vadd.xlane.f32.xlu1 %v861_v53 }
 0x3c4   :  { %940 = vperm.xlu1 %2411, %v2419_v25  }
 0x43c   :  { %v854_v47 = vpop.xlane.xlu1 %853 }
 0x43d   :  { %v864_v28 = vmul.f32 0.001953125, %v854_v47  ;;  %v1069_v47 = vadd.s32 392, %v4225_v39 }
 0x43f   :  { %v866_v49 = vmul.f32 %v864_v28, %v864_v28  ;;  %v869_v56 = vsub.f32 %v3300_v1, %v864_v28  ;;  %v870_v32 = vsub.f32 %v3302_v33, %v864_v28  ;;  %v871_v45 = vsub.f32 %v3312_v4, %v864_v28 }
 0x440   :  { %v863_v27 = vpop.xlane.xlu1 %862  ;;  %v868_v22 = vsub.f32 %v3298_v44, %v864_v28  ;;  %vm1138_vm10 = vcmp.eq.s32.totalorder %v1069_v47, %v3391_v30 }
 0x441   :  { %v865_v8 = vmul.f32 0.001953125, %v863_v27  ;;  %vm3444_vm11 = vmpackc.low %vm1138_vm10, %vm1137_vm12 }
 0x443   :  { %v867_v19 = vsub.f32 %v865_v8, %v866_v49  ;;  %v1024_v49 = vadd.s32 32, %v4225_v39  ;;  %v1025_v8 = vadd.s32 40, %v4225_v39 }
 0x444   :  { %v941_v23 = vpop.permute.xlu1 %940 }
 0x445   :  { %v872_v52 = vadd.f32 1e-05, %v867_v19  ;;  %v3333_v3 = vadd.f32 %v941_v23, %v938_v54  ;;  %v3335_v41 = vadd.f32 %v941_v23, %v936_v40  ;;  %v3337_v57 = vadd.f32 %v941_v23, %v937_v37 }
 0x446   :  { %v3341_v51 = vadd.f32 %v941_v23, %v935_v29  ;;  %v1070_v40 = vadd.s32 400, %v4225_v39  ;;  %v1071_v54 = vadd.s32 408, %v4225_v39  ;;  %vm1093_vm12 = vcmp.eq.s32.totalorder %v1024_v49, %v3391_v30 }
 0x447   :  { %2417 = vrsqrt.f32 %v872_v52  ;;  %v954_v42 = vmax.f32 %v3333_v3, 0.0  ;;  %v952_v17 = vmax.f32 %v3335_v41, 0.0  ;;  %v953_v58 = vmax.f32 %v3337_v57, 0.0 }
 0x448   :  { %v951_v38 = vmax.f32 %v3341_v51, 0.0  ;;  %vm1094_vm10 = vcmp.eq.s32.totalorder %v1025_v8, %v3391_v30  ;;  %vm1139_vm9 = vcmp.eq.s32.totalorder %v1070_v40, %v3391_v30  ;;  %v1054_v3 = vadd.s32 272, %v4225_v39 }
 0x449   :  { %969 = vrot.lane.b32.xlu0 %v954_v42, %s2429_s9  ;;  %961 = vrot.lane.b32.xlu1 %v952_v17, %s2429_s9  ;;  %v1055_v57 = vadd.s32 280, %v4225_v39  ;;  %v1043_v51 = vadd.s32 184, %v4225_v39  ;;  %v1076_v49 = vadd.s32 448, %v4225_v39  ;;  %v1077_v8 = vadd.s32 456, %v4225_v39 }
 0x44a   :  { %v4264_v40 = vmov 0 }
 0x44b   :  { %vm1124_vm3 = vcmp.eq.s32.totalorder %v1055_v57, %v3391_v30  ;;  %v1049_v57 = vadd.s32 232, %v4225_v39 }
 0x44d   :  { %965 = vrot.lane.b32.xlu1 %v953_v58, %s2429_s9  ;;  %957 = vrot.lane.b32.xlu0 %v951_v38, %s2429_s9 }
 0x451   :  { %v2418_v62 = vpop.eup %2417 }
 0x452   :  { %v875_v20 = vmul.f32 %v2418_v62, %v869_v56  ;;  %v876_v61 = vmul.f32 %v2418_v62, %v870_v32  ;;  %v877_v35 = vmul.f32 %v2418_v62, %v871_v45  ;;  %v874_v1 = vmul.f32 %v2418_v62, %v868_v22 }
 0x453   :  { %v1072_v45 = vadd.s32 416, %v4225_v39  ;;  %v1056_v22 = vadd.s32 288, %v4225_v39 }
 0x454   :  { %v883_v46 = vmul.f32 %v880_v18, %v875_v20  ;;  %v884_v10 = vmul.f32 %v880_v18, %v876_v61  ;;  %v885_v9 = vmul.f32 %v880_v18, %v877_v35  ;;  %v882_v53 = vmul.f32 %v880_v18, %v874_v1 }
 0x455   :  { %v2442_v18 = vmov 1.0|1.0   ;;  %v4246_v61 = vmov 0  ;;  %v4250_v35 = vmov 0  ;;  %v4252_v1 = vmov 0 }
 0x456   :  { %v3360_v60 = vadd.f32 %v888_v13, %v883_v46  ;;  %v3364_v50 = vadd.f32 %v888_v13, %v884_v10  ;;  %v3370_v4 = vadd.f32 %v888_v13, %v885_v9  ;;  %v3376_v25 = vadd.f32 %v888_v13, %v882_v53  ;;  %2118 = vmatprep.subr.msk.bf16.mxu0 %vm3398_vm5, %v2442_v18 }
 0x457   :  { %2120 = vmatpush3.bf16.msk.msra.mxu0 %vm3405_vm15, %v2442_v18  ;;  %2150 = vmatprep.subr.msk.bf16.mxu1 %vm3444_vm11, %v2442_v18  ;;  %v1073_v46 = vadd.s32 424, %v4225_v39  ;;  %v4248_v10 = vmov 0  ;;  %v1057_v9 = vadd.s32 296, %v4225_v39  ;;  %v1044_v53 = vadd.s32 192, %v4225_v39 }
 0x458   :  { %v948_v7 = vmax.f32 %v3360_v60, 0.0  ;;  %v949_v33 = vmax.f32 %v3364_v50, 0.0  ;;  %v950_v44 = vmax.f32 %v3370_v4, 0.0  ;;  %v947_v59 = vmax.f32 %v3376_v25, 0.0  ;;  %2122 = vmatprep.subr.msk.bf16.mxu0 %vm3422_vm14, %v2442_v18  ;;  %2152 = vmatpush3.bf16.msk.msra.mxu1 %vm3467_vm8, %v2442_v18 }
 0x459   :  { %v4275_v60 = vmov 0  ;;  %v4282_v50 = vmov 0  ;;  %v1066_v25 = vadd.s32 368, %v4225_v39 }
 0x45a   :  { %959 = vrot.lane.b32.xlu1 %v948_v7, %s2429_s9 }
 0x45b   :  { %2124 = vmatpush3.bf16.msk.msra.mxu0 %vm3433_vm6, %v2442_v18 }
 0x45c   :  { %2126 = vmatprep.subr.msk.bf16.mxu0 %vm3496_vm0, %v2442_v18 }
 0x45e   :  { %963 = vrot.lane.b32.xlu1 %v949_v33, %s2429_s9 }
 0x462   :  { %967 = vrot.lane.b32.xlu1 %v950_v44, %s2429_s9 }
 0x466   :  { %955 = vrot.lane.b32.xlu1 %v947_v59, %s2429_s9 }
 0x4bb   :  { %v970_v15 = vpop.permute.xlu0 %969  ;;  %v962_v16 = vpop.permute.xlu1 %961 }
 0x4bf   :  { %v966_v43 = vpop.permute.xlu1 %965  ;;  %v958_v27 = vpop.permute.xlu0 %957 }
 0x4c0   :  { %v972_v19 = vsel %vm4236_vm2, %v966_v43, %v970_v15  ;;  %v974_v37 = vsel %vm4237_vm1, %v962_v16, %v966_v43  ;;  %v976_v23 = vsel %vm4238_vm13, %v958_v27, %v962_v16  ;;  %v978_v29 = vsel %vm4239_vm7, %v970_v15, %v958_v27  ;;  %vm3507_vm1 = vmpackc.low %vm1094_vm10, %vm1093_vm12 }
 0x4c1   :  { %v3473_v56 = vmax.f32 %v952_v17, %v974_v37  ;;  %v3477_v32 = vmax.f32 %v953_v58, %v972_v19  ;;  %v3481_v62 = vmax.f32 %v951_v38, %v976_v23  ;;  %v3485_v20 = vmax.f32 %v954_v42, %v978_v29  ;;  %2128 = vmatpush3.bf16.msk.msra.mxu0 %vm3507_vm1, %v2442_v18 }
 0x4c2   :  { %vm1140_vm2 = vcmp.eq.s32.totalorder %v1071_v54, %v3391_v30  ;;  %v4244_v42 = vmov 0  ;;  %v1042_v17 = vadd.s32 176, %v4225_v39  ;;  %v1026_v58 = vadd.s32 48, %v4225_v39 }
 0x4c3   :  { %993 = vrot.lane.b32.xlu0 %v3473_v56, %s2430_s10  ;;  %v4245_v42 = vsel %vm3507_vm1, 4294967295, %v4244_v42  ;;  %v1027_v38 = vadd.s32 56, %v4225_v39  ;;  %vm3518_vm13 = vmpackc.low %vm1140_vm2, %vm1139_vm9  ;;  %vm1123_vm7 = vcmp.eq.s32.totalorder %v1054_v3, %v3391_v30  ;;  %vm1112_vm10 = vcmp.eq.s32.totalorder %v1043_v51, %v3391_v30 }
 0x4c4   :  { %v4247_v61 = vsel %vm3518_vm13, 4294967295, %v4246_v61  ;;  %2154 = vmatprep.subr.msk.bf16.mxu1 %vm3518_vm13, %v2442_v18  ;;  %vm3529_vm4 = vmpackc.low %vm1124_vm3, %vm1123_vm7  ;;  %vm1111_vm12 = vcmp.eq.s32.totalorder %v1042_v17, %v3391_v30  ;;  %vm1095_vm9 = vcmp.eq.s32.totalorder %v1026_v58, %v3391_v30  ;;  %vm1141_vm7 = vcmp.eq.s32.totalorder %v1072_v45, %v3391_v30 }
 0x4c5   :  { %v4249_v10 = vsel %vm3529_vm4, 4294967295, %v4248_v10  ;;  %vm1096_vm2 = vcmp.eq.s32.totalorder %v1027_v38, %v3391_v30  ;;  %2156 = vmatpush3.bf16.msk.msra.mxu1 %vm3529_vm4, %v2442_v18  ;;  %vm3542_vm1 = vmpackc.low %vm1112_vm10, %vm1111_vm12  ;;  %vm1142_vm3 = vcmp.eq.s32.totalorder %v1073_v46, %v3391_v30  ;;  %vm1125_vm10 = vcmp.eq.s32.totalorder %v1056_v22, %v3391_v30 }
 0x4c6   :  { %v4251_v35 = vsel %vm3542_vm1, 4294967295, %v4250_v35  ;;  %2130 = vmatprep.subr.msk.bf16.mxu0 %vm3542_vm1, %v2442_v18  ;;  %vm3553_vm13 = vmpackc.low %vm1096_vm2, %vm1095_vm9  ;;  %vm1126_vm9 = vcmp.eq.s32.totalorder %v1057_v9, %v3391_v30  ;;  %v1075_v15 = vadd.s32 440, %v4225_v39  ;;  %v4256_v16 = vmov 0 }
 0x4c7   :  { %997 = vrot.lane.b32.xlu0 %v3477_v32, %s2430_s10  ;;  %v4253_v1 = vsel %vm3553_vm13, 4294967295, %v4252_v1  ;;  %2132 = vmatpush3.bf16.msk.msra.mxu0 %vm3553_vm13, %v2442_v18  ;;  %vm3564_vm12 = vmpackc.low %vm1142_vm3, %vm1141_vm7  ;;  %vm1113_vm7 = vcmp.eq.s32.totalorder %v1044_v53, %v3391_v30  ;;  %vm1114_vm3 = vcmp.eq.s32.totalorder %v1045_v48, %v3391_v30  ;;  %vm1097_vm13 = vcmp.eq.s32.totalorder %v1028_v2, %v3391_v30 }
 0x4c8   :  { %v4255_v6 = vsel %vm3564_vm12, 4294967295, %v4254_v6  ;;  %2158 = vmatprep.subr.msk.bf16.mxu1 %vm3564_vm12, %v2442_v18  ;;  %vm3575_vm2 = vmpackc.low %vm1126_vm9, %vm1125_vm10  ;;  %vm1098_vm1 = vcmp.eq.s32.totalorder %v1029_v5, %v3391_v30  ;;  %vm1143_vm10 = vcmp.eq.s32.totalorder %v1074_v14, %v3391_v30  ;;  %vm1144_vm9 = vcmp.eq.s32.totalorder %v1075_v15, %v3391_v30 }
 0x4c9   :  { %v4257_v16 = vsel %vm3575_vm2, 4294967295, %v4256_v16  ;;  %2160 = vmatpush3.bf16.msk.msra.mxu1 %vm3575_vm2, %v2442_v18  ;;  %vm3588_vm12 = vmpackc.low %vm1114_vm3, %vm1113_vm7  ;;  %v1031_v43 = vadd.s32 88, %v4225_v39  ;;  %v4262_v27 = vmov 0  ;;  %v4266_v54 = vmov 0 }
 0x4ca   :  { %v4259_v24 = vsel %vm3588_vm12, 4294967295, %v4258_v24  ;;  %2134 = vmatprep.subr.msk.bf16.mxu0 %vm3588_vm12, %v2442_v18  ;;  %vm3601_vm4 = vmpackc.low %vm1098_vm1, %vm1097_vm13  ;;  %vm1127_vm1 = vcmp.eq.s32.totalorder %v1058_v0, %v3391_v30  ;;  %vm1128_vm13 = vcmp.eq.s32.totalorder %v1059_v55, %v3391_v30  ;;  %v1060_v19 = vadd.s32 320, %v4225_v39 }
 0x4cb   :  { %989 = vrot.lane.b32.xlu0 %v3481_v62, %s2430_s10  ;;  %v4261_v34 = vsel %vm3601_vm4, 4294967295, %v4260_v34  ;;  %2136 = vmatpush3.bf16.msk.msra.mxu0 %vm3601_vm4, %v2442_v18  ;;  %vm3612_vm7 = vmpackc.low %vm1144_vm9, %vm1143_vm10  ;;  %vm1115_vm10 = vcmp.eq.s32.totalorder %v1046_v63, %v3391_v30  ;;  %vm1116_vm9 = vcmp.eq.s32.totalorder %v1047_v21, %v3391_v30  ;;  %vm1099_vm4 = vcmp.eq.s32.totalorder %v1030_v36, %v3391_v30 }
 0x4cc   :  { %v3596_v47 = vpop.permute.xlu1 %959  ;;  %v4263_v27 = vsel %vm3612_vm7, 4294967295, %v4262_v27  ;;  %2162 = vmatprep.subr.msk.bf16.mxu1 %vm3612_vm7, %v2442_v18  ;;  %vm3623_vm3 = vmpackc.low %vm1128_vm13, %vm1127_vm1  ;;  %vm1100_vm12 = vcmp.eq.s32.totalorder %v1031_v43, %v3391_v30  ;;  %vm1145_vm1 = vcmp.eq.s32.totalorder %v1076_v49, %v3391_v30  ;;  %vm1146_vm13 = vcmp.eq.s32.totalorder %v1077_v8, %v3391_v30 }
 0x4cd   :  { %v4265_v40 = vsel %vm3623_vm3, 4294967295, %v4264_v40  ;;  %2164 = vmatpush3.bf16.msk.msra.mxu1 %vm3623_vm3, %v2442_v18  ;;  %vm3636_vm7 = vmpackc.low %vm1116_vm9, %vm1115_vm10  ;;  %v1061_v37 = vadd.s32 328, %v4225_v39  ;;  %v4268_v29 = vmov 0  ;;  %v1048_v3 = vadd.s32 224, %v4225_v39 }
 0x4ce   :  { %v4267_v54 = vsel %vm3636_vm7, 4294967295, %v4266_v54  ;;  %2138 = vmatprep.subr.msk.bf16.mxu0 %vm3636_vm7, %v2442_v18  ;;  %vm3647_vm2 = vmpackc.low %vm1100_vm12, %vm1099_vm4  ;;  %v1032_v17 = vadd.s32 96, %v4225_v39  ;;  %v1033_v51 = vadd.s32 104, %v4225_v39  ;;  %vm4270_vm10 = vcmp.lt.s32.totalorder %v2581_v26, 127 }
 0x4cf   :  { %1001 = vrot.lane.b32.xlu0 %v3485_v20, %s2430_s10  ;;  %v4269_v29 = vsel %vm3647_vm2, 4294967295, %v4268_v29  ;;  %2140 = vmatpush3.bf16.msk.msra.mxu0 %vm3647_vm2, %v2442_v18  ;;  %vm3661_vm4 = vmpackc.low %vm1146_vm13, %vm1145_vm1  ;;  %v4271_v38 = vmov 0  ;;  %vm1129_vm12 = vcmp.eq.s32.totalorder %v1060_v19, %v3391_v30  ;;  %vm1130_vm9 = vcmp.eq.s32.totalorder %v1061_v37, %v3391_v30 }
 0x4d0   :  { %v964_v23 = vpop.permute.xlu1 %963  ;;  %v4272_v38 = vsel %vm3661_vm4, 4294967295, %v4271_v38  ;;  %v1078_v45 = vadd.s32 464, %v4225_v39  ;;  %2166 = vmatprep.subr.msk.bf16.mxu1 %vm3661_vm4, %v2442_v18  ;;  %v4273_v22 = vmov 0  ;;  %vm1117_vm1 = vcmp.eq.s32.totalorder %v1048_v3, %v3391_v30 }
 0x4d1   :  { %v973_v58 = vsel %vm4270_vm10, %v3596_v47, %v964_v23  ;;  %vm3675_vm10 = vmpackc.low %vm1130_vm9, %vm1129_vm12  ;;  %vm1118_vm13 = vcmp.eq.s32.totalorder %v1049_v57, %v3391_v30  ;;  %vm1101_vm2 = vcmp.eq.s32.totalorder %v1032_v17, %v3391_v30  ;;  %vm1102_vm4 = vcmp.eq.s32.totalorder %v1033_v51, %v3391_v30 }
 0x4d2   :  { %v3670_v46 = vmax.f32 %v948_v7, %v973_v58  ;;  %v4274_v22 = vsel %vm3675_vm10, 4294967295, %v4273_v22  ;;  %2168 = vmatpush3.bf16.msk.msra.mxu1 %vm3675_vm10, %v2442_v18  ;;  %vm3685_vm7 = vmpackc.low %vm1118_vm13, %vm1117_vm1  ;;  %v1079_v7 = vadd.s32 472, %v4225_v39  ;;  %vm1147_vm12 = vcmp.eq.s32.totalorder %v1078_v45, %v3391_v30 }
 0x4d3   :  { %v4276_v60 = vsel %vm3685_vm7, 4294967295, %v4275_v60  ;;  %v1062_v9 = vadd.s32 336, %v4225_v39  ;;  %2142 = vmatprep.subr.msk.bf16.mxu0 %vm3685_vm7, %v2442_v18  ;;  %vm3698_vm9 = vmpackc.low %vm1102_vm4, %vm1101_vm2  ;;  %v4277_v48 = vmov 0  ;;  %v1063_v2 = vadd.s32 344, %v4225_v39 }
 0x4d4   :  { %991 = vrot.lane.b32.xlu1 %v3670_v46, %s2430_s10  ;;  %v968_v53 = vpop.permute.xlu1 %967  ;;  %v4278_v48 = vsel %vm3698_vm9, 4294967295, %v4277_v48  ;;  %v1050_v5 = vadd.s32 240, %v4225_v39  ;;  %v1051_v14 = vadd.s32 248, %v4225_v39  ;;  %v1034_v15 = vadd.s32 112, %v4225_v39  ;;  %2144 = vmatpush3.bf16.msk.msra.mxu0 %vm3698_vm9, %v2442_v18 }
 0x4d5   :  { %vm4279_vm1 = vcmp.lt.s32.totalorder %v2581_v26, 127  ;;  %vm1148_vm2 = vcmp.eq.s32.totalorder %v1079_v7, %v3391_v30  ;;  %vm1131_vm4 = vcmp.eq.s32.totalorder %v1062_v9, %v3391_v30  ;;  %v1035_v55 = vadd.s32 120, %v4225_v39 }
 0x4d6   :  { %v971_v0 = vsel %vm4279_vm1, %v964_v23, %v968_v53  ;;  %vm3720_vm13 = vmpackc.low %vm1148_vm2, %vm1147_vm12  ;;  %vm1132_vm1 = vcmp.eq.s32.totalorder %v1063_v2, %v3391_v30  ;;  %vm1119_vm9 = vcmp.eq.s32.totalorder %v1050_v5, %v3391_v30  ;;  %vm1120_vm7 = vcmp.eq.s32.totalorder %v1051_v14, %v3391_v30 }
 0x4d7   :  { %v3716_v63 = vmax.f32 %v949_v33, %v971_v0  ;;  %2170 = vmatprep.subr.msk.bf16.mxu1 %vm3720_vm13, %v2442_v18  ;;  %vm3730_vm10 = vmpackc.low %vm1132_vm1, %vm1131_vm4  ;;  %vm1103_vm3 = vcmp.eq.s32.totalorder %v1034_v15, %v3391_v30  ;;  %vm1104_vm12 = vcmp.eq.s32.totalorder %v1035_v55, %v3391_v30  ;;  %v1080_v33 = vadd.s32 480, %v4225_v39 }
 0x4d8   :  { %v4283_v50 = vsel %vm3730_vm10, 4294967295, %v4282_v50  ;;  %v1081_v36 = vadd.s32 488, %v4225_v39  ;;  %v956_v43 = vpop.permute.xlu1 %955  ;;  %2172 = vmatpush3.bf16.msk.msra.mxu1 %vm3730_vm10, %v2442_v18  ;;  %vm3743_vm2 = vmpackc.low %vm1120_vm7, %vm1119_vm9  ;;  %v1064_v8 = vadd.s32 352, %v4225_v39  ;;  %v1065_v19 = vadd.s32 360, %v4225_v39 }
 0x4d9   :  { %995 = vrot.lane.b32.xlu1 %v3716_v63, %s2430_s10  ;;  %v1082_v37 = vadd.s32 496, %v4225_v39  ;;  %v1083_v23 = vadd.s32 504, %v4225_v39  ;;  %vm4286_vm4 = vcmp.lt.s32.totalorder %v2581_v26, 127  ;;  %2146 = vmatprep.subr.msk.bf16.mxu0 %vm3743_vm2, %v2442_v18  ;;  %vm3757_vm7 = vmpackc.low %vm1104_vm12, %vm1103_vm3  ;;  %v4287_v57 = vmov 0 }
 0x4da   :  { %v975_v3 = vsel %vm4286_vm4, %v956_v43, %v3596_v47  ;;  %v4288_v57 = vsel %vm3757_vm7, 4294967295, %v4287_v57  ;;  %vm1149_vm9 = vcmp.eq.s32.totalorder %v1080_v33, %v3391_v30  ;;  %vm1150_vm1 = vcmp.eq.s32.totalorder %v1081_v36, %v3391_v30  ;;  %vm4289_vm10 = vmmov %vm4286_vm4  ;;  %2148 = vmatpush3.bf16.msk.msra.mxu0 %vm3757_vm7, %v2442_v18 }
 0x4db   :  { %v977_v17 = vsel %vm4289_vm10, %v968_v53, %v956_v43  ;;  %v979_v51 = vmax.f32 %v947_v59, %v975_v3  ;;  %vm3770_vm4 = vmpackc.low %vm1150_vm1, %vm1149_vm9  ;;  %vm1133_vm3 = vcmp.eq.s32.totalorder %v1064_v8, %v3391_v30  ;;  %vm1134_vm12 = vcmp.eq.s32.totalorder %v1065_v19, %v3391_v30  ;;  %2182 = vmatprep.subr.msk.bf16.mxu0 %vm3398_vm5, %v2442_v18 }
 0x4dc   :  { %2174 = vmatprep.subr.msk.bf16.mxu1 %vm3770_vm4, %v2442_v18  ;;  %vm3779_vm10 = vmpackc.low %vm1134_vm12, %vm1133_vm3  ;;  %vm1151_vm9 = vcmp.eq.s32.totalorder %v1082_v37, %v3391_v30  ;;  %vm1152_vm1 = vcmp.eq.s32.totalorder %v1083_v23, %v3391_v30  ;;  %v1067_v59 = vadd.s32 376, %v4225_v39  ;;  %vm1135_vm5 = vcmp.eq.s32.totalorder %v1066_v25, %v3391_v30 }
 0x4dd   :  { %987 = vrot.lane.b32.xlu1 %v979_v51, %s2430_s10  ;;  %2176 = vmatpush3.bf16.msk.msra.mxu1 %vm3779_vm10, %v2442_v18  ;;  %vm3794_vm3 = vmpackc.low %vm1152_vm1, %vm1151_vm9  ;;  %v982_v39 = vmax.f32 %v950_v44, %v977_v17  ;;  %vm4298_vm9 = vcmp.lt.s32.totalorder %v2581_v26, 112 }
 0x4de   :  { %2178 = vmatprep.subr.msk.bf16.mxu1 %vm3794_vm3, %v2442_v18  ;;  %vm1136_vm12 = vcmp.eq.s32.totalorder %v1067_v59, %v3391_v30  ;;  %vm4299_vm1 = vmmov %vm4298_vm9 }
 0x4df   :  { %vm3805_vm7 = vmpackc.low %vm1136_vm12, %vm1135_vm5 }
 0x4e0   :  { %vm4300_vm5 = vmmov %vm4299_vm1 }
 0x4e1   :  { %999 = vrot.lane.b32.xlu1 %v982_v39, %s2430_s10  ;;  %2180 = vmatpush3.bf16.msk.msra.mxu1 %vm3805_vm7, %v2442_v18  ;;  %vm4302_vm12 = vmmov %vm4299_vm1 }
 0x4e2   :  { %2214 = vmatprep.subr.msk.bf16.mxu1 %vm3444_vm11, %v2442_v18  ;;  %vm4301_vm11 = vmmov %vm4299_vm1 }
 0x535   :  { %v994_v7 = vpop.permute.xlu0 %993 }
 0x539   :  { %v998_v9 = vpop.permute.xlu0 %997 }
 0x53a   :  { %v1006_v4 = vsel %vm4298_vm9, %v994_v7, %v998_v9  ;;  %vm4303_vm9 = vmmov %vm4299_vm1 }
 0x53b   :  { %v1016_v5 = vmax.f32 %v3473_v56, %v1006_v4 }
 0x53d   :  { %v990_v53 = vpop.permute.xlu0 %989 }
 0x53e   :  { %v1008_v15 = vsel %vm4300_vm5, %v990_v53, %v994_v7  ;;  %vm4304_vm5 = vmmov %vm4299_vm1 }
 0x53f   :  { %v1015_v36 = vmax.f32 %v3481_v62, %v1008_v15 }
 0x541   :  { %v1002_v11 = vpop.permute.xlu0 %1001 }
 0x542   :  { %v1004_v43 = vsel %vm4302_vm12, %v998_v9, %v1002_v11  ;;  %vm4311_vm12 = vnez %v4257_v16 }
 0x543   :  { %v1017_v3 = vmax.f32 %v3477_v32, %v1004_v43 }
 0x546   :  { %v992_v30 = vpop.permute.xlu1 %991 }
 0x54b   :  { %v996_v44 = vpop.permute.xlu1 %995 }
 0x54c   :  { %v1005_v2 = vsel %vm4299_vm1, %v992_v30, %v996_v44 }
 0x54d   :  { %v1012_v14 = vmax.f32 %v3670_v46, %v1005_v2  ;;  %v1010_v46 = vsel %vm4303_vm9, %v1002_v11, %v990_v53  ;;  %vm4312_vm9 = vnez %v4259_v24 }
 0x54f   :  { %v3824_v0 = vpack.c.bf16 %v1016_v5, %v1012_v14  ;;  %v988_v55 = vpop.permute.xlu1 %987 }
 0x550   :  { %v1007_v33 = vsel %vm4301_vm11, %v988_v55, %v992_v30  ;;  %vm4310_vm11 = vnez %v4253_v1 }
 0x551   :  { %v1011_v8 = vmax.f32 %v979_v51, %v1007_v33  ;;  %v1286_v56 = vunpack.c.l.bf16 %v3824_v0  ;;  %v1290_v25 = vunpack.c.h.bf16 %v3824_v0  ;;  %v1018_v51 = vmax.f32 %v3485_v20, %v1010_v46 }
 0x553   :  { %v3834_v19 = vpack.c.bf16 %v1015_v36, %v1011_v8  ;;  %v1000_v37 = vpop.permute.xlu1 %999  ;;  %v1294_v23 = vsub.f32 %v1012_v14, %v1286_v56  ;;  %v1298_v2 = vsub.f32 %v1016_v5, %v1290_v25 }
 0x554   :  { %v1003_v17 = vsel %vm4299_vm1, %v996_v44, %v1000_v37  ;;  %v1009_v62 = vsel %vm4304_vm5, %v1000_v37, %v988_v55  ;;  %vm4313_vm1 = vnez %v4263_v27  ;;  %vm4314_vm5 = vnez %v4261_v34 }
 0x555   :  { %v1285_v59 = vunpack.c.l.bf16 %v3834_v19  ;;  %v1013_v7 = vmax.f32 %v3716_v63, %v1003_v17  ;;  %v1014_v9 = vmax.f32 %v982_v39, %v1009_v62  ;;  %1365 = vmatprep.mubr.f32.mxu0 %v1294_v23  ;;  %v1289_v32 = vunpack.c.h.bf16 %v3834_v19 }
 0x557   :  { %v1293_v30 = vsub.f32 %v1011_v8, %v1285_v59  ;;  %v1283_v53 = vpack.c.bf16 %v1017_v3, %v1013_v7  ;;  %v1284_v4 = vpack.c.bf16 %v1018_v51, %v1014_v9  ;;  %v1297_v63 = vsub.f32 %v1015_v36, %v1289_v32 }
 0x559   :  { %v1287_v44 = vunpack.c.l.bf16 %v1283_v53  ;;  %1366 = vmatmul.mubr.f32.vlgmr.msra.gmra.mrb[4].mxu0 %v1293_v30  ;;  %v1288_v26 = vunpack.c.l.bf16 %v1284_v4  ;;  %v1292_v20 = vunpack.c.h.bf16 %v1284_v4  ;;  %v1291_v15 = vunpack.c.h.bf16 %v1283_v53 }
 0x55a   :  { %2184 = vmatpush3.bf16.msk.msra.mxu0 %vm3405_vm15, %v2442_v18  ;;  %1370 = vmatprep.mubr.f32.mxu0 %v1298_v2  ;;  %vm4305_vm15 = vnez %v4247_v61 }
 0x55b   :  { %v1295_v14 = vsub.f32 %v1013_v7, %v1287_v44  ;;  %2186 = vmatprep.subr.msk.bf16.mxu0 %vm3422_vm14, %v2442_v18  ;;  %v1296_v39 = vsub.f32 %v1014_v9, %v1288_v26  ;;  %v1300_v5 = vsub.f32 %v1018_v51, %v1292_v20  ;;  %v1299_v13 = vsub.f32 %v1017_v3, %v1291_v15 }
 0x55c   :  { %vm4306_vm14 = vnez %v4245_v42 }
 0x55d   :  { %1371 = vmatmul.mubr.f32.gmra.mrb[6].mxu0 %v1297_v63  ;;  %1440 = vmatprep.mubr.f32.mxu1 %v1296_v39 }
 0x55e   :  { %2188 = vmatpush3.bf16.msk.msra.mxu0 %vm3433_vm6, %v2442_v18  ;;  %1441 = vmatmul.mubr.f32.vlgmr.msra.gmra.mrb[4].mxu1 %v1295_v14  ;;  %vm4307_vm6 = vnez %v4249_v10 }
 0x55f   :  { %1515 = vmatprep.mubr.f32.mxu0 %v1286_v56  ;;  %2216 = vmatpush3.bf16.msk.msra.mxu1 %vm3467_vm8, %v2442_v18  ;;  %vm4308_vm8 = vnez %v4251_v35 }
 0x560   :  { %1445 = vmatprep.mubr.f32.mxu1 %v1300_v5  ;;  %2190 = vmatprep.subr.msk.bf16.mxu0 %vm3496_vm0, %v2442_v18  ;;  %vm4309_vm0 = vnez %v4255_v6 }
 0x561   :  { %2218 = vmatprep.subr.msk.bf16.mxu1 %vm4305_vm15, %v2442_v18  ;;  %vm4315_vm15 = vnez %v4265_v40 }
 0x562   :  { %2192 = vmatpush3.bf16.msk.msra.mxu0 %vm4306_vm14, %v2442_v18  ;;  %1446 = vmatmul.mubr.f32.gmra.mrb[6].mxu1 %v1299_v13  ;;  %vm4316_vm14 = vnez %v4267_v54 }
 0x563   :  { %2220 = vmatpush3.bf16.msk.msra.mxu1 %vm4307_vm6, %v2442_v18  ;;  %1590 = vmatprep.mubr.f32.mxu1 %v1288_v26  ;;  %vm4317_vm6 = vnez %v4272_v38 }
 0x564   :  { %2194 = vmatprep.subr.msk.bf16.mxu0 %vm4308_vm8, %v2442_v18  ;;  %2222 = vmatprep.subr.msk.bf16.mxu1 %vm4309_vm0, %v2442_v18  ;;  %vm4318_vm8 = vnez %v4269_v29  ;;  %vm4319_vm0 = vnez %v4274_v22 }
 0x566   :  { %2196 = vmatpush3.bf16.msk.msra.mxu0 %vm4310_vm11, %v2442_v18  ;;  %vm4320_vm11 = vnez %v4276_v60 }
 0x567   :  { %2224 = vmatpush3.bf16.msk.msra.mxu1 %vm4311_vm12, %v2442_v18  ;;  %2198 = vmatprep.subr.msk.bf16.mxu0 %vm4312_vm9, %v2442_v18  ;;  %vm4321_vm12 = vnez %v4278_v48  ;;  %vm4322_vm9 = vnez %v4283_v50 }
 0x568   :  { %2226 = vmatprep.subr.msk.bf16.mxu1 %vm4313_vm1, %v2442_v18  ;;  %vm4323_vm1 = vnez %v4288_v57 }
 0x56a   :  { %2200 = vmatpush3.bf16.msk.msra.mxu0 %vm4314_vm5, %v2442_v18 }
 0x56b   :  { %2228 = vmatpush3.bf16.msk.msra.mxu1 %vm4315_vm15, %v2442_v18  ;;  %2202 = vmatprep.subr.msk.bf16.mxu0 %vm4316_vm14, %v2442_v18 }
 0x56c   :  { %2230 = vmatprep.subr.msk.bf16.mxu1 %vm4317_vm6, %v2442_v18 }
 0x56e   :  { %2204 = vmatpush3.bf16.msk.msra.mxu0 %vm4318_vm8, %v2442_v18 }
 0x56f   :  { %2232 = vmatpush3.bf16.msk.msra.mxu1 %vm4319_vm0, %v2442_v18  ;;  %2206 = vmatprep.subr.msk.bf16.mxu0 %vm4320_vm11, %v2442_v18 }
 0x570   :  { %2234 = vmatprep.subr.msk.bf16.mxu1 %vm3720_vm13, %v2442_v18 }
 0x572   :  { %2208 = vmatpush3.bf16.msk.msra.mxu0 %vm4321_vm12, %v2442_v18 }
 0x573   :  { %2236 = vmatpush3.bf16.msk.msra.mxu1 %vm4322_vm9, %v2442_v18  ;;  %2210 = vmatprep.subr.msk.bf16.mxu0 %vm3743_vm2, %v2442_v18 }
 0x574   :  { %2238 = vmatprep.subr.msk.bf16.mxu1 %vm3770_vm4, %v2442_v18 }
 0x576   :  { %2212 = vmatpush3.bf16.msk.msra.mxu0 %vm4323_vm1, %v2442_v18 }
 0x577   :  { %2240 = vmatpush3.bf16.msk.msra.mxu1 %vm3779_vm10, %v2442_v18 }
 0x578   :  { %2242 = vmatprep.subr.msk.bf16.mxu1 %vm3794_vm3, %v2442_v18 }
 0x579   :  { %1516 = vmatmul.mubr.f32.vlgmr.msra.gmra.mrb[8].mxu0 %v1285_v59 }
 0x57a   :  { %1520 = vmatprep.mubr.f32.mxu0 %v1290_v25 }
 0x57b   :  { %2244 = vmatpush3.bf16.msk.msra.mxu1 %vm3805_vm7, %v2442_v18 }
 0x57d   :  { %1521 = vmatmul.mubr.f32.gmra.mrb[10].mxu0 %v1289_v32 }
 0x57e   :  { %1591 = vmatmul.mubr.f32.vlgmr.msra.gmra.mrb[8].mxu1 %v1287_v44 }
 0x57f   :  { %1595 = vmatprep.mubr.f32.mxu1 %v1292_v20 }
 0x582   :  { %1596 = vmatmul.mubr.f32.gmra.mrb[10].mxu1 %v1291_v15 }
 0x62c   :  { %v1901_v28 = vpop.f32.mrb[4].mxu0 }
 0x62d   :  { %v1902_v12 = vpop.f32.mrb[5].mxu0 }
 0x62e   :  { %v1903_v52 = vadd.f32 %v1902_v12, %v1901_v28 }
 0x630   :  { %v1904_v41 = vpop.f32.mrb[6].mxu0 }
 0x631   :  { %v1905_v42 = vpop.f32.mrb[7].mxu0  ;;  %v1939_v61 = vpop.f32.mrb[4].mxu1 }
 0x632   :  { %v1906_v10 = vadd.f32 %v1905_v42, %v1904_v41  ;;  %v1940_v35 = vpop.f32.mrb[5].mxu1 }
 0x633   :  { %v1941_v1 = vadd.f32 %v1940_v35, %v1939_v61 }
 0x635   :  { %v1443_v6 = vadd.f32 %v1941_v1, %v1903_v52  ;;  %v1942_v16 = vpop.f32.mrb[6].mxu1 }
 0x636   :  { %v1943_v24 = vpop.f32.mrb[7].mxu1 }
 0x637   :  { %v1944_v34 = vadd.f32 %v1943_v24, %v1942_v16 }
 0x639   :  { %v1448_v27 = vadd.f32 %v1944_v34, %v1906_v10 }
 0x64c   :  { %v1977_v40 = vpop.f32.mrb[8].mxu0 }
 0x64d   :  { %v1978_v18 = vpop.f32.mrb[9].mxu0 }
 0x64e   :  { %v1979_v54 = vadd.f32 %v1978_v18, %v1977_v40 }
 0x650   :  { %v1518_v29 = vadd.f32 %v1979_v54, %v1443_v6  ;;  %v1980_v38 = vpop.f32.mrb[10].mxu0 }
 0x651   :  { %v1981_v22 = vpop.f32.mrb[11].mxu0  ;;  %v2015_v60 = vpop.f32.mrb[8].mxu1 }
 0x652   :  { %v1982_v48 = vadd.f32 %v1981_v22, %v1980_v38  ;;  %v2016_v21 = vpop.f32.mrb[9].mxu1 }
 0x653   :  { %v2017_v50 = vadd.f32 %v2016_v21, %v2015_v60 }
 0x654   :  { %v1523_v49 = vadd.f32 %v1982_v48, %v1448_v27 }
 0x655   :  { %v1593_v57 = vadd.f32 %v2017_v50, %v1518_v29  ;;  %v2018_v47 = vpop.f32.mrb[10].mxu1 }
 0x656   :  { %v2019_v58 = vpop.f32.mrb[11].mxu1 }
 0x657   :  { %1601 = vst [vmem:[%s3948_s6] sm:$0xff] %v1593_v57  ;;  %v2020_v45 = vadd.f32 %v2019_v58, %v2018_v47 }
 0x659   :  { %v1598_v31 = vadd.f32 %v2020_v45, %v1523_v49 }
 0x65b   :  { %1602 = vst [vmem:[%s3948_s6 + $0x8] sm:$0xf] %v1598_v31 }

</bundles_post_ra>
